<compile_context>
chip_gen: v7x
topology: tpu7x:2x2x1
jax: 0.10.0
libtpu: 0.0.40
codegen_flags: <defaults>
</compile_context>

<pallas_src>
import jax
import jax.numpy as jnp
from jax.experimental import pallas as pl
from jax.experimental.pallas import tpu as pltpu  # noqa: F401  (TPU backend assumed)


def _sigmoid(z):
    # exp lands on the EUP slot; divide is cheap at this size.
    return 1.0 / (1.0 + jnp.exp(-z))


def hyper_kernel(x_ref, w1_ref, b1_ref, w2_ref, b2_ref, w3_ref, b3_ref, h_ref):
    """H_net1: Linear+Sigmoid, Linear+Sigmoid, Linear -> flat H of shape [1, 54*54]."""
    cd = w1_ref.dtype  # bf16 matmul operands, f32 accumulation
    a = jnp.dot(x_ref[...].astype(cd), w1_ref[...],
                preferred_element_type=jnp.float32) + b1_ref[...]
    a = _sigmoid(a)
    a = jnp.dot(a.astype(cd), w2_ref[...],
                preferred_element_type=jnp.float32) + b2_ref[...]
    a = _sigmoid(a)
    h_ref[...] = jnp.dot(a.astype(cd), w3_ref[...],
                         preferred_element_type=jnp.float32) + b3_ref[...]


def mix_classify_kernel(x_ref, ht_ref,
                        w1_ref, b1_ref, w2_ref, b2_ref,
                        w3_ref, b3_ref, w4_ref, b4_ref, o_ref):
    """xm = x @ H^T, then X_net: 3x (Linear+ReLU), Linear, Softmax(dim=1)."""
    # mixing matmul kept in f32 (tiny: [1,54]@[54,54]; better accuracy)
    xm = jnp.dot(x_ref[...], ht_ref[...], preferred_element_type=jnp.float32)
    cd = w1_ref.dtype
    h = jnp.dot(xm.astype(cd), w1_ref[...],
                preferred_element_type=jnp.float32) + b1_ref[...]
    h = jnp.maximum(h, 0.0)
    h = jnp.dot(h.astype(cd), w2_ref[...],
                preferred_element_type=jnp.float32) + b2_ref[...]
    h = jnp.maximum(h, 0.0)
    h = jnp.dot(h.astype(cd), w3_ref[...],
                preferred_element_type=jnp.float32) + b3_ref[...]
    h = jnp.maximum(h, 0.0)
    logits = jnp.dot(h.astype(cd), w4_ref[...],
                     preferred_element_type=jnp.float32) + b4_ref[...]
    # softmax(dim=1) in f32; divide moved to the EUP via approx reciprocal
    m = jnp.max(logits, axis=-1, keepdims=True)
    e = jnp.exp(logits - m)
    denom = jnp.sum(e, axis=-1, keepdims=True)
    o_ref[...] = e * pl.reciprocal(denom, approx=True)


@jax.jit
def net_forward(x, prep):
    """x: [1, 54] float32. prep: dict name -> (w[in,out] bf16, b[1,out] f32)."""
    assert x.shape == (1, 54)
    hw1, hb1 = prep["h1"]
    hw2, hb2 = prep["h2"]
    hw3, hb3 = prep["h3"]
    xw1, xb1 = prep["x1"]
    xw2, xb2 = prep["x2"]
    xw3, xb3 = prep["x3"]
    xw4, xb4 = prep["x4"]

    # Kernel A: hypernetwork -> flat H [1, 2916]
    h_flat = pl.pallas_call(
        hyper_kernel,
        out_shape=jax.ShapeDtypeStruct((1, 54 * 54), jnp.float32),
    )(x, hw1, hb1, hw2, hb2, hw3, hb3)

    # TODO(synk): the [1,2916]->[54,54] reshape (+ transpose so the kernel can do
    # x @ H^T directly) is done here in the wrapper as pure layout plumbing on an
    # 11 KiB array; an in-kernel minor-dim relayout has no clean Mosaic equivalent.
    ht = jnp.reshape(h_flat, (54, 54)).T

    # Kernel B: mixing matmul + classifier + softmax -> [1, 7]
    return pl.pallas_call(
        mix_classify_kernel,
        out_shape=jax.ShapeDtypeStruct((1, 7), jnp.float32),
    )(x, ht, xw1, xb1, xw2, xb2, xw3, xb3, xw4, xb4)


_DIMS = {
    "h1": (54, 128), "h2": (128, 256), "h3": (256, 54 * 54),
    "x1": (54, 64), "x2": (64, 128), "x3": (128, 128), "x4": (128, 7),
}


def init_params(key):
    """nn.Linear-style init (uniform +-1/sqrt(fan_in)); weights stored as [in, out]."""
    params = {}
    for name, (fan_in, fan_out) in _DIMS.items():
        key, kw, kb = jax.random.split(key, 3)
        bound = 1.0 / (fan_in ** 0.5)
        w = jax.random.uniform(kw, (fan_in, fan_out), jnp.float32, -bound, bound)
        b = jax.random.uniform(kb, (1, fan_out), jnp.float32, -bound, bound)
        params[name] = (w, b)
    return params


def prepare_params(params, compute_dtype=jnp.bfloat16):
    """Cast weights once to the MXU operand dtype; keep biases in f32."""
    return {k: (w.astype(compute_dtype), b.astype(jnp.float32))
            for k, (w, b) in params.items()}


def ref_forward(x, prep):
    """Plain-JAX reference following the module, with the same dtype discipline."""
    def lin(h, name):
        w, b = prep[name]
        return jnp.dot(h.astype(w.dtype), w, preferred_element_type=jnp.float32) + b

    a = 1.0 / (1.0 + jnp.exp(-lin(x, "h1")))
    a = 1.0 / (1.0 + jnp.exp(-lin(a, "h2")))
    H = lin(a, "h3").reshape(54, 54)
    xm = jnp.dot(x, H.T, preferred_element_type=jnp.float32)   # == (H @ x^T)^T
    h = jnp.maximum(lin(xm, "x1"), 0.0)
    h = jnp.maximum(lin(h, "x2"), 0.0)
    h = jnp.maximum(lin(h, "x3"), 0.0)
    return jax.nn.softmax(lin(h, "x4"), axis=1)


if __name__ == "__main__":
    key = jax.random.PRNGKey(0)
    kx, kp = jax.random.split(key)

    # batch is 1 by construction of the module (H.reshape(54, 54))
    x = jax.random.normal(kx, (1, 54), jnp.float32)
    params = init_params(kp)
    prep = prepare_params(params)

    out = net_forward(x, prep)
    out = jax.block_until_ready(out)
    assert out.shape == (1, 7)

    r = ref_forward(x, prep)
    assert jnp.allclose(out, r, atol=2e-2, rtol=2e-2), (out, r)
    assert jnp.allclose(jnp.sum(out, axis=1), 1.0, atol=1e-2)
    print("KERNEL_OK")
</pallas_src>

<mosaic_0001>
module attributes {stable_mosaic.version = 11 : i64} {
  func.func @hyper_kernel(%arg0: memref<1x54xf32, #tpu.memory_space<vmem>>, %arg1: memref<54x128xbf16, #tpu.memory_space<vmem>>, %arg2: memref<1x128xf32, #tpu.memory_space<vmem>>, %arg3: memref<128x256xbf16, #tpu.memory_space<vmem>>, %arg4: memref<1x256xf32, #tpu.memory_space<vmem>>, %arg5: memref<256x2916xbf16, #tpu.memory_space<vmem>>, %arg6: memref<1x2916xf32, #tpu.memory_space<vmem>>, %arg7: memref<1x2916xf32, #tpu.memory_space<vmem>>) attributes {dimension_semantics = [], scalar_prefetch = 0 : i64, scratch_operands = 0 : i64, tpu.core_type = #tpu.core_type<tc>} {
    %c0 = arith.constant 0 : index
    %c0_0 = arith.constant 0 : index
    %0 = vector.load %arg0[%c0, %c0_0] : memref<1x54xf32, #tpu.memory_space<vmem>>, vector<1x54xf32>
    %1 = arith.truncf %0 : vector<1x54xf32> to vector<1x54xbf16>
    %c0_1 = arith.constant 0 : index
    %c0_2 = arith.constant 0 : index
    %2 = vector.load %arg1[%c0_1, %c0_2] : memref<54x128xbf16, #tpu.memory_space<vmem>>, vector<54x128xbf16>
    %cst = arith.constant dense<0.000000e+00> : vector<1x128xf32>
    %3 = tpu.matmul %1, %2, %cst {dimension_numbers = #tpu.dot_dimension_numbers<[1], [0], [0], [1], [0, 0, 1, 1], [], []>} : vector<1x54xbf16>, vector<54x128xbf16>, vector<1x128xf32> -> vector<1x128xf32>
    %c0_3 = arith.constant 0 : index
    %c0_4 = arith.constant 0 : index
    %4 = vector.load %arg2[%c0_3, %c0_4] : memref<1x128xf32, #tpu.memory_space<vmem>>, vector<1x128xf32>
    %5 = arith.addf %3, %4 : vector<1x128xf32>
    %cst_5 = arith.constant 0.000000e+00 : f32
    %6 = vector.broadcast %cst_5 : f32 to vector<1x128xf32>
    %7 = arith.subf %6, %5 : vector<1x128xf32>
    %8 = math.exp %7 : vector<1x128xf32>
    %cst_6 = arith.constant 1.000000e+00 : f32
    %9 = vector.broadcast %cst_6 : f32 to vector<1x128xf32>
    %10 = arith.addf %9, %8 : vector<1x128xf32>
    %cst_7 = arith.constant 1.000000e+00 : f32
    %11 = vector.broadcast %cst_7 : f32 to vector<1x128xf32>
    %12 = arith.divf %11, %10 : vector<1x128xf32>
    %13 = arith.truncf %12 : vector<1x128xf32> to vector<1x128xbf16>
    %c0_8 = arith.constant 0 : index
    %c0_9 = arith.constant 0 : index
    %14 = vector.load %arg3[%c0_8, %c0_9] : memref<128x256xbf16, #tpu.memory_space<vmem>>, vector<128x256xbf16>
    %cst_10 = arith.constant dense<0.000000e+00> : vector<1x256xf32>
    %15 = tpu.matmul %13, %14, %cst_10 {dimension_numbers = #tpu.dot_dimension_numbers<[1], [0], [0], [1], [0, 0, 1, 1], [], []>} : vector<1x128xbf16>, vector<128x256xbf16>, vector<1x256xf32> -> vector<1x256xf32>
    %c0_11 = arith.constant 0 : index
    %c0_12 = arith.constant 0 : index
    %16 = vector.load %arg4[%c0_11, %c0_12] : memref<1x256xf32, #tpu.memory_space<vmem>>, vector<1x256xf32>
    %17 = arith.addf %15, %16 : vector<1x256xf32>
    %cst_13 = arith.constant 0.000000e+00 : f32
    %18 = vector.broadcast %cst_13 : f32 to vector<1x256xf32>
    %19 = arith.subf %18, %17 : vector<1x256xf32>
    %20 = math.exp %19 : vector<1x256xf32>
    %cst_14 = arith.constant 1.000000e+00 : f32
    %21 = vector.broadcast %cst_14 : f32 to vector<1x256xf32>
    %22 = arith.addf %21, %20 : vector<1x256xf32>
    %cst_15 = arith.constant 1.000000e+00 : f32
    %23 = vector.broadcast %cst_15 : f32 to vector<1x256xf32>
    %24 = arith.divf %23, %22 : vector<1x256xf32>
    %25 = arith.truncf %24 : vector<1x256xf32> to vector<1x256xbf16>
    %c0_16 = arith.constant 0 : index
    %c0_17 = arith.constant 0 : index
    %26 = vector.load %arg5[%c0_16, %c0_17] : memref<256x2916xbf16, #tpu.memory_space<vmem>>, vector<256x2916xbf16>
    %cst_18 = arith.constant dense<0.000000e+00> : vector<1x2916xf32>
    %27 = tpu.matmul %25, %26, %cst_18 {dimension_numbers = #tpu.dot_dimension_numbers<[1], [0], [0], [1], [0, 0, 1, 1], [], []>} : vector<1x256xbf16>, vector<256x2916xbf16>, vector<1x2916xf32> -> vector<1x2916xf32>
    %c0_19 = arith.constant 0 : index
    %c0_20 = arith.constant 0 : index
    %28 = vector.load %arg6[%c0_19, %c0_20] : memref<1x2916xf32, #tpu.memory_space<vmem>>, vector<1x2916xf32>
    %29 = arith.addf %27, %28 : vector<1x2916xf32>
    %c0_21 = arith.constant 0 : index
    %c0_22 = arith.constant 0 : index
    %30 = vector.load %arg7[%c0_21, %c0_22] : memref<1x2916xf32, #tpu.memory_space<vmem>>, vector<1x2916xf32>
    tpu.vector_store %arg7[%c0_21, %c0_22], %29 {strides = array<i32>} : memref<1x2916xf32, #tpu.memory_space<vmem>>, vector<1x2916xf32>,
    return
  }
}

module attributes {stable_mosaic.version = 11 : i64} {
  func.func @mix_classify_kernel(%arg0: memref<1x54xf32, #tpu.memory_space<vmem>>, %arg1: memref<54x54xf32, #tpu.memory_space<vmem>>, %arg2: memref<54x64xbf16, #tpu.memory_space<vmem>>, %arg3: memref<1x64xf32, #tpu.memory_space<vmem>>, %arg4: memref<64x128xbf16, #tpu.memory_space<vmem>>, %arg5: memref<1x128xf32, #tpu.memory_space<vmem>>, %arg6: memref<128x128xbf16, #tpu.memory_space<vmem>>, %arg7: memref<1x128xf32, #tpu.memory_space<vmem>>, %arg8: memref<128x7xbf16, #tpu.memory_space<vmem>>, %arg9: memref<1x7xf32, #tpu.memory_space<vmem>>, %arg10: memref<1x7xf32, #tpu.memory_space<vmem>>) attributes {dimension_semantics = [], scalar_prefetch = 0 : i64, scratch_operands = 0 : i64, tpu.core_type = #tpu.core_type<tc>} {
    %c0 = arith.constant 0 : index
    %c0_0 = arith.constant 0 : index
    %0 = vector.load %arg0[%c0, %c0_0] : memref<1x54xf32, #tpu.memory_space<vmem>>, vector<1x54xf32>
    %c0_1 = arith.constant 0 : index
    %c0_2 = arith.constant 0 : index
    %1 = vector.load %arg1[%c0_1, %c0_2] : memref<54x54xf32, #tpu.memory_space<vmem>>, vector<54x54xf32>
    %cst = arith.constant dense<0.000000e+00> : vector<1x54xf32>
    %2 = tpu.matmul %0, %1, %cst {dimension_numbers = #tpu.dot_dimension_numbers<[1], [0], [0], [1], [0, 0, 1, 1], [], []>} : vector<1x54xf32>, vector<54x54xf32>, vector<1x54xf32> -> vector<1x54xf32>
    %3 = arith.truncf %2 : vector<1x54xf32> to vector<1x54xbf16>
    %c0_3 = arith.constant 0 : index
    %c0_4 = arith.constant 0 : index
    %4 = vector.load %arg2[%c0_3, %c0_4] : memref<54x64xbf16, #tpu.memory_space<vmem>>, vector<54x64xbf16>
    %cst_5 = arith.constant dense<0.000000e+00> : vector<1x64xf32>
    %5 = tpu.matmul %3, %4, %cst_5 {dimension_numbers = #tpu.dot_dimension_numbers<[1], [0], [0], [1], [0, 0, 1, 1], [], []>} : vector<1x54xbf16>, vector<54x64xbf16>, vector<1x64xf32> -> vector<1x64xf32>
    %c0_6 = arith.constant 0 : index
    %c0_7 = arith.constant 0 : index
    %6 = vector.load %arg3[%c0_6, %c0_7] : memref<1x64xf32, #tpu.memory_space<vmem>>, vector<1x64xf32>
    %7 = arith.addf %5, %6 : vector<1x64xf32>
    %cst_8 = arith.constant 0.000000e+00 : f32
    %8 = vector.broadcast %cst_8 : f32 to vector<1x64xf32>
    %9 = arith.maximumf %7, %8 : vector<1x64xf32>
    %10 = arith.truncf %9 : vector<1x64xf32> to vector<1x64xbf16>
    %c0_9 = arith.constant 0 : index
    %c0_10 = arith.constant 0 : index
    %11 = vector.load %arg4[%c0_9, %c0_10] : memref<64x128xbf16, #tpu.memory_space<vmem>>, vector<64x128xbf16>
    %cst_11 = arith.constant dense<0.000000e+00> : vector<1x128xf32>
    %12 = tpu.matmul %10, %11, %cst_11 {dimension_numbers = #tpu.dot_dimension_numbers<[1], [0], [0], [1], [0, 0, 1, 1], [], []>} : vector<1x64xbf16>, vector<64x128xbf16>, vector<1x128xf32> -> vector<1x128xf32>
    %c0_12 = arith.constant 0 : index
    %c0_13 = arith.constant 0 : index
    %13 = vector.load %arg5[%c0_12, %c0_13] : memref<1x128xf32, #tpu.memory_space<vmem>>, vector<1x128xf32>
    %14 = arith.addf %12, %13 : vector<1x128xf32>
    %cst_14 = arith.constant 0.000000e+00 : f32
    %15 = vector.broadcast %cst_14 : f32 to vector<1x128xf32>
    %16 = arith.maximumf %14, %15 : vector<1x128xf32>
    %17 = arith.truncf %16 : vector<1x128xf32> to vector<1x128xbf16>
    %c0_15 = arith.constant 0 : index
    %c0_16 = arith.constant 0 : index
    %18 = vector.load %arg6[%c0_15, %c0_16] : memref<128x128xbf16, #tpu.memory_space<vmem>>, vector<128x128xbf16>
    %cst_17 = arith.constant dense<0.000000e+00> : vector<1x128xf32>
    %19 = tpu.matmul %17, %18, %cst_17 {dimension_numbers = #tpu.dot_dimension_numbers<[1], [0], [0], [1], [0, 0, 1, 1], [], []>} : vector<1x128xbf16>, vector<128x128xbf16>, vector<1x128xf32> -> vector<1x128xf32>
    %c0_18 = arith.constant 0 : index
    %c0_19 = arith.constant 0 : index
    %20 = vector.load %arg7[%c0_18, %c0_19] : memref<1x128xf32, #tpu.memory_space<vmem>>, vector<1x128xf32>
    %21 = arith.addf %19, %20 : vector<1x128xf32>
    %cst_20 = arith.constant 0.000000e+00 : f32
    %22 = vector.broadcast %cst_20 : f32 to vector<1x128xf32>
    %23 = arith.maximumf %21, %22 : vector<1x128xf32>
    %24 = arith.truncf %23 : vector<1x128xf32> to vector<1x128xbf16>
    %c0_21 = arith.constant 0 : index
    %c0_22 = arith.constant 0 : index
    %25 = vector.load %arg8[%c0_21, %c0_22] : memref<128x7xbf16, #tpu.memory_space<vmem>>, vector<128x7xbf16>
    %cst_23 = arith.constant dense<0.000000e+00> : vector<1x7xf32>
    %26 = tpu.matmul %24, %25, %cst_23 {dimension_numbers = #tpu.dot_dimension_numbers<[1], [0], [0], [1], [0, 0, 1, 1], [], []>} : vector<1x128xbf16>, vector<128x7xbf16>, vector<1x7xf32> -> vector<1x7xf32>
    %c0_24 = arith.constant 0 : index
    %c0_25 = arith.constant 0 : index
    %27 = vector.load %arg9[%c0_24, %c0_25] : memref<1x7xf32, #tpu.memory_space<vmem>>, vector<1x7xf32>
    %28 = arith.addf %26, %27 : vector<1x7xf32>
    %cst_26 = arith.constant dense<0xFF800000> : vector<1xf32>
    %29 = vector.multi_reduction <maximumf>, %28, %cst_26 [1] : vector<1x7xf32> to vector<1xf32>
    %30 = vector.shape_cast %29 : vector<1xf32> to vector<1x1xf32>
    %31 = vector.broadcast %30 : vector<1x1xf32> to vector<1x7xf32>
    %32 = arith.subf %28, %31 : vector<1x7xf32>
    %33 = math.exp %32 : vector<1x7xf32>
    %cst_27 = arith.constant dense<0.000000e+00> : vector<1xf32>
    %34 = vector.multi_reduction <add>, %33, %cst_27 [1] : vector<1x7xf32> to vector<1xf32>
    %35 = vector.shape_cast %34 : vector<1xf32> to vector<1x1xf32>
    %36 = tpu.reciprocal %35 {approx = true} : vector<1x1xf32> -> vector<1x1xf32>
    %37 = vector.broadcast %36 : vector<1x1xf32> to vector<1x7xf32>
    %38 = arith.mulf %33, %37 : vector<1x7xf32>
    %c0_28 = arith.constant 0 : index
    %c0_29 = arith.constant 0 : index
    %39 = vector.load %arg10[%c0_28, %c0_29] : memref<1x7xf32, #tpu.memory_space<vmem>>, vector<1x7xf32>
    tpu.vector_store %arg10[%c0_28, %c0_29], %38 {strides = array<i32>} : memref<1x7xf32, #tpu.memory_space<vmem>>, vector<1x7xf32>,
    return
  }
}

</mosaic_0001>

<bundles_post_ra>
// kernel: net_forward.3
= control target key start
LH: loop header
LB: loop body
LE: loop exit
PB: predicated region body
PF: predicated region fallthrough
CT: control target
= control target key end

     0   :  { %v730_v3 = vmov 0.0|0.0   ;;  %v731_v6 = vmov 0.0   ;;  %vm732_vm0 = vmmov 0   ;;  %vm49_vm1 = vcmask 1045504   ;;  %s950_s0 = inlined_call_operand.vmem [shape: f32[1,54], index: 0, kind: input, shape index: {}]   ;;  %s951_s1 = inlined_call_operand.vmem [shape: f32[54,54], index: 1, kind: input, shape index: {}]   ;;  %s952_s2 = inlined_call_operand.vmem [shape: bf16[54,64], index: 2, kind: input, shape index: {}]   ;;  %s953_s3 = inlined_call_operand.vmem [shape: f32[1,64], index: 3, kind: input, shape index: {}]   ;;  %s954_s4 = inlined_call_operand.vmem [shape: bf16[64,128], index: 4, kind: input, shape index: {}]   ;;  %s955_s5 = inlined_call_operand.vmem [shape: f32[1,128], index: 5, kind: input, shape index: {}]   ;;  %s956_s6 = inlined_call_operand.vmem [shape: bf16[128,128], index: 6, kind: input, shape index: {}]   ;;  %s957_s7 = inlined_call_operand.vmem [shape: f32[1,128], index: 7, kind: input, shape index: {}]   ;;  %s958_s8 = inlined_call_operand.vmem [shape: bf16[128,7], index: 8, kind: input, shape index: {}]   ;;  %s959_s9 = inlined_call_operand.vmem [shape: f32[1,7], index: 9, kind: input, shape index: {}]   ;;  %s960_s10 = inlined_call_operand.hbm [shape: f32[1,7], index: 10, kind: output, shape index: {}]  }
   0x1   :  { %v38_v0 = vld [vmem:[%s951_s1] sm:$0xff]  ;;  %v39_v1 = vld [vmem:[%s951_s1 + $0x8] sm:$0xff]  ;;  %v40_v2 = vld [vmem:[%s951_s1 + $0x10] sm:$0xff]  ;;  %665 = vmatprep.subr.bf16.mxu0 %v730_v3  ;;  %601 = vmatprep.subr.bf16.mxu1 %v731_v6  ;;  %vm45_vm2 = vcmask 441344  }
   0x2   :  { %v666_v4 = vpack.c.bf16 %v39_v1, %v38_v0  ;;  %v41_v5 = vld [vmem:[%s951_s1 + $0x18] sm:$0xff]  ;;  %v42_v7 = vld [vmem:[%s951_s1 + $0x20] sm:$0xff]  ;;  %598 = vmatprep.mubr.msk.f32.mxu0 %vm732_vm0, %v731_v6  ;;  %609 = vmatprep.mubr.msk.bf16.mxu1 %vm732_vm0, %v731_v6  ;;  %v43_v10 = vld [vmem:[%s951_s1 + $0x28] sm:$0xff] }
   0x3   :  { %v669_v8 = vpack.c.bf16 %v41_v5, %v40_v2  ;;  %v678_v9 = vld [vmem:[%s952_s2] sm:$0xff]   ;;  %v679_v11 = vld [vmem:[%s952_s2 + $0x8] sm:$0xff]   ;;  %v672_v12 = vpack.c.bf16 %v43_v10, %v42_v7  ;;  %v680_v13 = vld [vmem:[%s952_s2 + $0x10] sm:$0xff]  }
   0x4   :  { %667 = vmatpush3.bf16.msra.mxu0 %v666_v4  ;;  %602 = vmatpush3.bf16.msra.mxu1 %v678_v9  ;;  %v44_v14 = vld [vmem:[%s951_s1 + $0x30] sm:$0x3f]  ;;  %v37_v15 = vld [vmem:[%s950_s0] sm:$0x1] }
   0x5   :  { %668 = vmatprep.subr.bf16.mxu0 %v730_v3  ;;  %603 = vmatprep.subr.bf16.mxu1 %v731_v6 }
   0x8   :  { %670 = vmatpush3.bf16.msra.mxu0 %v669_v8  ;;  %604 = vmatpush3.bf16.msra.mxu1 %v679_v11 }
   0x9   :  { %671 = vmatprep.subr.bf16.mxu0 %v730_v3  ;;  %605 = vmatprep.subr.bf16.mxu1 %v731_v6 }
   0xc   :  { %673 = vmatpush3.bf16.msra.mxu0 %v672_v12  ;;  %606 = vmatpush3.bf16.msra.mxu1 %v680_v13 }
   0xd   :  { %596 = vmatprep.subr.mxu0 %v731_v6  ;;  %607 = vmatprep.subr.bf16.mxu1 %v731_v6 }
  0x10   :  { %597 = vmatpush3.msk.msra.mxu0 %vm49_vm1, %v44_v14 }
  0x11   :  { %599 = vmatmul.mubr.msk.f32.vlgmr.msra.gmra.mrb[0].mxu0 %vm45_vm2, %v37_v15  ;;  %613 = vmatprep.subr.bf16.mxu0 %v731_v6 }
  0x12   :  { %621 = vmatprep.mubr.msk.bf16.mxu0 %vm732_vm0, %v731_v6 }
  0x13   :  { %15 = vsyncpa [#allocation3], 0  ;;  %v681_v16 = vld [vmem:[%s952_s2 + $0x18] ss:$0 sps:$4 sm:$0x77]   ;;  %vm156_vm3 = vcmask 1042432  }
  0x14   :  { %v158_v17 = vsel %vm156_vm3, %v681_v16, 0  ;;  %v682_v18 = vld [vmem:[%s954_s4] sm:$0xff]   ;;  %v683_v19 = vld [vmem:[%s954_s4 + $0x8] sm:$0xff]   ;;  %v684_v23 = vld [vmem:[%s954_s4 + $0x10] sm:$0xff]   ;;  %vm235_vm4 = vcmask 523264   ;;  %vm493_vm5 = vcmask 49152  }
  0x15   :  { %608 = vmatpush3.bf16.msra.mxu1 %v158_v17  ;;  %614 = vmatpush3.bf16.msra.mxu0 %v682_v18  ;;  %v685_v24 = vld [vmem:[%s954_s4 + $0x18] sm:$0xff]   ;;  %v686_v25 = vld [vmem:[%s956_s6] sm:$0xff]   ;;  %v687_v26 = vld [vmem:[%s956_s6 + $0x8] sm:$0xff]  }
  0x16   :  { %625 = vmatprep.subr.bf16.mxu1 %v731_v6  ;;  %615 = vmatprep.subr.bf16.mxu0 %v731_v6  ;;  %v688_v27 = vld [vmem:[%s956_s6 + $0x10] sm:$0xff]   ;;  %v689_v28 = vld [vmem:[%s956_s6 + $0x18] sm:$0xff]   ;;  %v690_v29 = vld [vmem:[%s956_s6 + $0x20] sm:$0xff]  }
  0x17   :  { %v691_v30 = vld [vmem:[%s956_s6 + $0x28] sm:$0xff]   ;;  %v131_v31 = vld [vmem:[%s953_s3] sm:$0x1]  ;;  %v692_v39 = vld [vmem:[%s956_s6 + $0x30] sm:$0xff]  }
  0x18   :  { %v693_v40 = vld [vmem:[%s956_s6 + $0x38] sm:$0xff]   ;;  %v694_v41 = vld [vmem:[%s958_s8] sm:$0xff]   ;;  %v695_v42 = vld [vmem:[%s958_s8 + $0x8] sm:$0xff]  }
  0x19   :  { %616 = vmatpush3.bf16.msra.mxu0 %v683_v19  ;;  %v696_v43 = vld [vmem:[%s958_s8 + $0x10] sm:$0xff]   ;;  %v697_v44 = vld [vmem:[%s958_s8 + $0x18] sm:$0xff]   ;;  %v698_v45 = vld [vmem:[%s958_s8 + $0x20] sm:$0xff]  }
  0x1a   :  { %617 = vmatprep.subr.bf16.mxu0 %v731_v6  ;;  %v699_v46 = vld [vmem:[%s958_s8 + $0x28] sm:$0xff]   ;;  %v210_v47 = vld [vmem:[%s955_s5] sm:$0x1]  ;;  %v700_v55 = vld [vmem:[%s958_s8 + $0x30] sm:$0xff]  }
  0x1b   :  { %v701_v56 = vld [vmem:[%s958_s8 + $0x38] sm:$0xff]   ;;  %v297_v57 = vld [vmem:[%s957_s7] sm:$0x1]  ;;  %s733_s7 = smov [#allocation2]  }
  0x1c   :  { %v404_v1 = vld [vmem:[%s959_s9] sm:$0x1]  ;;  %s512_s8 = sshll.u32 %s733_s7, 4  ;;  %s513_s8 = int_to_ptr.vmem [resolvable:$true] %s512_s8 }
  0x1d   :  { %618 = vmatpush3.bf16.msra.mxu0 %v684_v23  ;;  %s706_s9 = scalar_lea.vmem %s513_s8, 16  ;;  %s710_s14 = scalar_lea.vmem %s513_s8, 32 }
  0x1e   :  { %619 = vmatprep.subr.bf16.mxu0 %v731_v6  ;;  %p707_p0 = scmp.ne.s32.totalorder %s513_s8, %s706_s9  ;;  %p711_p1 = scmp.lt.s32.totalorder %s513_s8, %s513_s8 }
  0x1f   :  { %p712_p2 = scmp.lt.s32.totalorder %s710_s14, %s706_s9 }
  0x21   :  { %620 = vmatpush3.bf16.msra.mxu0 %v685_v24  ;;  %p713_p3 = por %p712_p2, %p711_p1 }
  0x22   :  { %645 = vmatprep.subr.bf16.mxu0 %v731_v6 }
  0x23   :  { %p714_p4 = pnand %p713_p3, %p707_p0 }
  0xe4   :  { %v119_v20 = vpop.f32.mrb[0].mxu0 }
  0xe5   :  { %v123_v21 = vpack.c.bf16 %v119_v20, %v119_v20  ;;  %v600_v22 = vpop.f32.mrb[1].mxu0 }
  0xe7   :  { %610 = vmatmul.mubr.msk.bf16.vlgmr.msra.gmra.mrb[0].mxu1 %vm45_vm2, %v123_v21 }
  0xe8   :  { %641 = vmatprep.mubr.msk.bf16.mxu1 %vm732_vm0, %v731_v6  ;;  %626 = vmatpush3.bf16.msra.mxu1 %v686_v25 }
  0xe9   :  { %627 = vmatprep.subr.bf16.mxu1 %v731_v6 }
  0xec   :  { %628 = vmatpush3.bf16.msra.mxu1 %v687_v26 }
  0xed   :  { %629 = vmatprep.subr.bf16.mxu1 %v731_v6 }
  0xf0   :  { %630 = vmatpush3.bf16.msra.mxu1 %v688_v27 }
  0xf1   :  { %631 = vmatprep.subr.bf16.mxu1 %v731_v6 }
  0xf4   :  { %632 = vmatpush3.bf16.msra.mxu1 %v689_v28 }
  0xf5   :  { %633 = vmatprep.subr.bf16.mxu1 %v731_v6 }
  0xf8   :  { %634 = vmatpush3.bf16.msra.mxu1 %v690_v29 }
  0xf9   :  { %635 = vmatprep.subr.bf16.mxu1 %v731_v6 }
  0xfc   :  { %636 = vmatpush3.bf16.msra.mxu1 %v691_v30 }
  0xfd   :  { %637 = vmatprep.subr.bf16.mxu1 %v731_v6 }
 0x100   :  { %638 = vmatpush3.bf16.msra.mxu1 %v692_v39 }
 0x101   :  { %639 = vmatprep.subr.bf16.mxu1 %v731_v6 }
 0x104   :  { %640 = vmatpush3.bf16.msra.mxu1 %v693_v40 }
 0x1ba   :  { %v194_v32 = vpop.f32.mrb[0].mxu1 }
 0x1bb   :  { %v195_v33 = vadd.f32 %v194_v32, %v131_v31  ;;  %v611_v34 = vpop.f32.mrb[1].mxu1 }
 0x1bc   :  { %v197_v35 = vpop.f32.mrb[2].mxu1 }
 0x1bd   :  { %v200_v36 = vmax.f32 %v195_v33, 0.0  ;;  %v612_v37 = vpop.f32.mrb[3].mxu1 }
 0x1bf   :  { %v201_v38 = vpack.c.bf16 %v200_v36, %v200_v36 }
 0x1c1   :  { %622 = vmatmul.mubr.msk.bf16.vlgmr.msra.gmra.mrb[4].mxu0 %vm235_vm4, %v201_v38 }
 0x1c2   :  { %661 = vmatprep.mubr.msk.bf16.mxu0 %vm732_vm0, %v731_v6  ;;  %646 = vmatpush3.bf16.msra.mxu0 %v694_v41 }
 0x1c3   :  { %647 = vmatprep.subr.bf16.mxu0 %v731_v6 }
 0x1c6   :  { %648 = vmatpush3.bf16.msra.mxu0 %v695_v42 }
 0x1c7   :  { %649 = vmatprep.subr.bf16.mxu0 %v731_v6 }
 0x1ca   :  { %650 = vmatpush3.bf16.msra.mxu0 %v696_v43 }
 0x1cb   :  { %651 = vmatprep.subr.bf16.mxu0 %v731_v6 }
 0x1ce   :  { %652 = vmatpush3.bf16.msra.mxu0 %v697_v44 }
 0x1cf   :  { %653 = vmatprep.subr.bf16.mxu0 %v731_v6 }
 0x1d2   :  { %654 = vmatpush3.bf16.msra.mxu0 %v698_v45 }
 0x1d3   :  { %655 = vmatprep.subr.bf16.mxu0 %v731_v6 }
 0x1d6   :  { %656 = vmatpush3.bf16.msra.mxu0 %v699_v46 }
 0x1d7   :  { %657 = vmatprep.subr.bf16.mxu0 %v731_v6 }
 0x1da   :  { %658 = vmatpush3.bf16.msra.mxu0 %v700_v55 }
 0x1db   :  { %659 = vmatprep.subr.bf16.mxu0 %v731_v6 }
 0x1de   :  { %660 = vmatpush3.bf16.msra.mxu0 %v701_v56 }
 0x294   :  { %v273_v48 = vpop.f32.mrb[4].mxu0 }
 0x295   :  { %v274_v49 = vadd.f32 %v273_v48, %v210_v47  ;;  %v623_v50 = vpop.f32.mrb[5].mxu0 }
 0x296   :  { %v276_v51 = vpop.f32.mrb[6].mxu0 }
 0x297   :  { %v279_v52 = vmax.f32 %v274_v49, 0.0  ;;  %v624_v53 = vpop.f32.mrb[7].mxu0 }
 0x299   :  { %v280_v54 = vpack.c.bf16 %v279_v52, %v279_v52 }
 0x29b   :  { %642 = vmatmul.mubr.bf16.vlgmr.msra.gmra.mrb[4].mxu1 %v280_v54 }
 0x36e   :  { %v380_v58 = vpop.f32.mrb[4].mxu1 }
 0x36f   :  { %v381_v59 = vadd.f32 %v380_v58, %v297_v57  ;;  %v643_v60 = vpop.f32.mrb[5].mxu1 }
 0x370   :  { %v383_v61 = vpop.f32.mrb[6].mxu1 }
 0x371   :  { %v386_v62 = vmax.f32 %v381_v59, 0.0  ;;  %v644_v63 = vpop.f32.mrb[7].mxu1 }
 0x373   :  { %v387_v0 = vpack.c.bf16 %v386_v62, %v386_v62 }
 0x375   :  { %662 = vmatmul.mubr.bf16.vlgmr.msra.gmra.mrb[8].mxu0 %v387_v0 }
 0x448   :  { %v487_v2 = vpop.f32.mrb[8].mxu0 }
 0x449   :  { %v488_v3 = vadd.f32 %v487_v2, %v404_v1  ;;  %v663_v4 = vpop.f32.mrb[9].mxu0 }
 0x44a   :  { %v490_v5 = vpop.f32.mrb[10].mxu0 }
 0x44b   :  { %v664_v6 = vpop.f32.mrb[11].mxu0  ;;  %v494_v7 = vsel %vm493_vm5, %v488_v3, -inf }
 0x44c   :  { %495 = vmax.xlane.f32.xlu0 %v494_v7 }
 0x4d9   :  { %v496_v8 = vpop.xlane.xlu0 %495 }
 0x4da   :  { %v497_v9 = vsub.f32 %v488_v3, %v496_v8 }
 0x4dc   :  { %v498_v10 = vmul.f32 1.442695, %v497_v9 }
 0x4de   :  { %702 = vpow2.f32 %v498_v10 }
 0x4e8   :  { %v703_v11 = vpop.eup %702 }
 0x4e9   :  { %v500_v12 = vsel %vm493_vm5, %v703_v11, 0.0 }
 0x4ea   :  { %501 = vadd.xlane.f32.xlu0 %v500_v12 }
 0x577   :  { %v502_v13 = vpop.xlane.xlu0 %501 }
 0x578   :  { %704 = vrcp.f32 %v502_v13 }
 0x582   :  { %v705_v14 = vpop.eup %704 }
 0x583   :  { %v504_v15 = vmul.f32 %v705_v14, %v703_v11 }
 0x585   :  { %505 = vst.msk [vmem:[#allocation2] sm:$0x1] %vm493_vm5, %v504_v15 }
 0x586   :  { %717 = shalt.err (!%p714_p4)
}
 0x587   :  { %s718_s3 = scalar_lea.hbm %s960_s10, 16 }
 0x588   :  { %p719_p5 = scmp.ne.s32.totalorder %s960_s10, %s718_s3  ;;  %p722_p6 = scmp.lt.u32.totalorder %s718_s3, %s960_s10 }
 0x58a   :  { %p724_p7 = pnand %p722_p6, %p719_p5 }
 0x58c   :  { %727 = shalt.err (!%p724_p7)
}
 0x58d   :  { %515 = dma.vmem_to_hbm [thread:$0]  %s513_s8, 16, %s960_s10, [#allocation3]  }
 0x58e   :  { %728 = dma.done.wait [#allocation3], 16  }
 0x58f   :  { %729 = vsyncadd [#allocation3], 4294967280 }
 0x590   :  { %519 = vsyncpa [#allocation3], 1 }

// kernel: net_forward.2
= control target key start
LH: loop header
LB: loop body
LE: loop exit
PB: predicated region body
PF: predicated region fallthrough
CT: control target
= control target key end

     0   :  { %v4327_v0 = vmov 0.0   ;;  %vm4328_vm0 = vmmov 0   ;;  %vm62_vm1 = vcmask 1042432   ;;  %vm58_vm2 = vcmask 441344   ;;  %s5683_s1 = inlined_call_operand.vmem [shape: bf16[54,128], index: 1, kind: input, shape index: {}]   ;;  %s5684_s0 = inlined_call_operand.vmem [shape: f32[1,54], index: 0, kind: input, shape index: {}]   ;;  %s5685_s3 = inlined_call_operand.vmem [shape: bf16[128,256], index: 3, kind: input, shape index: {}]   ;;  %s5686_s5 = inlined_call_operand.vmem [shape: bf16[256,2916], index: 5, kind: input, shape index: {}]   ;;  %s5687_s2 = inlined_call_operand.vmem [shape: f32[1,128], index: 2, kind: input, shape index: {}]   ;;  %s5688_s4 = inlined_call_operand.vmem [shape: f32[1,256], index: 4, kind: input, shape index: {}]   ;;  %s5689_s6 = inlined_call_operand.vmem [shape: f32[1,2916], index: 6, kind: input, shape index: {}]   ;;  %s5690_s7 = inlined_call_operand.vmem [shape: f32[1,2916], index: 7, kind: output, shape index: {}]  }
   0x1   :  { %3727 = vmatprep.subr.bf16.mxu0 %v4327_v0  ;;  %v3743_v1 = vld [vmem:[%s5683_s1] sm:$0xff]   ;;  %3735 = vmatprep.mubr.msk.bf16.mxu0 %vm4328_vm0, %v4327_v0  ;;  %v3744_v2 = vld [vmem:[%s5683_s1 + $0x8] sm:$0xff]   ;;  %v3745_v3 = vld [vmem:[%s5683_s1 + $0x10] sm:$0xff]   ;;  %v4329_v22 = vmov 0  }
   0x2   :  { %3728 = vmatpush3.bf16.msra.mxu0 %v3743_v1  ;;  %v3746_v4 = vld [vmem:[%s5683_s1 + $0x18] ss:$0 sps:$4 sm:$0x77]   ;;  %v27_v5 = vld [vmem:[%s5684_s0] sm:$0x1]  ;;  %253 = vmatprep.mubr.bf16.mxu1 %v4329_v22 }
   0x3   :  { %3729 = vmatprep.subr.bf16.mxu0 %v4327_v0  ;;  %v64_v6 = vsel %vm62_vm1, %v3746_v4, 0  ;;  %v28_v7 = vpack.c.bf16 %v27_v5, %v27_v5  ;;  %v3747_v8 = vld [vmem:[%s5685_s3 + $0x4] ss:$8 sps:$4 sm:$0xff]   ;;  %v3749_v9 = vld [vmem:[%s5685_s3] ss:$8 sps:$4 sm:$0xff]  }
   0x4   :  { %221 = vmatprep.subr.bf16.mxu1 %v3747_v8  ;;  %v3750_v10 = vld [vmem:[%s5685_s3 + $0x14] ss:$8 sps:$4 sm:$0xff]   ;;  %v3752_v11 = vld [vmem:[%s5685_s3 + $0x10] ss:$8 sps:$4 sm:$0xff]   ;;  %v3753_v12 = vld [vmem:[%s5685_s3 + $0x24] ss:$8 sps:$4 sm:$0xff]  }
   0x5   :  { %222 = vmatpush1.bf16.msra.mxu1 %v3749_v9  ;;  %v3755_v13 = vld [vmem:[%s5685_s3 + $0x20] ss:$8 sps:$4 sm:$0xff]   ;;  %v3756_v14 = vld [vmem:[%s5685_s3 + $0x34] ss:$8 sps:$4 sm:$0xff]   ;;  %v3758_v15 = vld [vmem:[%s5685_s3 + $0x30] ss:$8 sps:$4 sm:$0xff]  }
   0x6   :  { %3730 = vmatpush3.bf16.msra.mxu0 %v3744_v2  ;;  %223 = vmatprep.subr.bf16.mxu1 %v3750_v10  ;;  %v3759_v16 = vld [vmem:[%s5685_s3 + $0x44] ss:$8 sps:$4 sm:$0xff]   ;;  %v3761_v17 = vld [vmem:[%s5685_s3 + $0x40] ss:$8 sps:$4 sm:$0xff]   ;;  %v3762_v18 = vld [vmem:[%s5685_s3 + $0x54] ss:$8 sps:$4 sm:$0xff]  }
   0x7   :  { %3731 = vmatprep.subr.bf16.mxu0 %v4327_v0  ;;  %v3764_v19 = vld [vmem:[%s5685_s3 + $0x50] ss:$8 sps:$4 sm:$0xff]   ;;  %v3765_v20 = vld [vmem:[%s5685_s3 + $0x64] ss:$8 sps:$4 sm:$0xff]   ;;  %v3767_v21 = vld [vmem:[%s5685_s3 + $0x60] ss:$8 sps:$4 sm:$0xff]  }
   0x8   :  { %v3768_v23 = vld [vmem:[%s5685_s3 + $0x74] ss:$8 sps:$4 sm:$0xff]   ;;  %v3770_v24 = vld [vmem:[%s5685_s3 + $0x70] ss:$8 sps:$4 sm:$0xff]   ;;  %v3773_v26 = vld [vmem:[%s5686_s5 + $0x4] ss:$92 sps:$4 sm:$0xff]  }
   0x9   :  { %224 = vmatpush1.bf16.msra.mxu1 %v3752_v11  ;;  %v3771_v25 = vld [vmem:[%s5686_s5] ss:$92 sps:$4 sm:$0xff]   ;;  %v3776_v27 = vld [vmem:[%s5686_s5 + $0xc] ss:$92 sps:$4 sm:$0xff]   ;;  %v3777_v29 = vld [vmem:[%s5686_s5 + $0xb8] ss:$92 sps:$4 sm:$0xff]  }
   0xa   :  { %3732 = vmatpush3.bf16.msra.mxu0 %v3745_v3  ;;  %225 = vmatprep.subr.bf16.mxu1 %v3753_v12  ;;  %v3779_v28 = vld [vmem:[%s5686_s5 + $0xbc] ss:$92 sps:$4 sm:$0xff]   ;;  %v3785_v30 = vld [vmem:[%s5686_s5 + $0x174] ss:$92 sps:$4 sm:$0xff]   ;;  %v3791_v32 = vld [vmem:[%s5686_s5 + $0x22c] ss:$92 sps:$4 sm:$0xff]  }
   0xb   :  { %3733 = vmatprep.subr.bf16.mxu0 %v4327_v0  ;;  %v3783_v31 = vld [vmem:[%s5686_s5 + $0x170] ss:$92 sps:$4 sm:$0xff]   ;;  %v3789_v33 = vld [vmem:[%s5686_s5 + $0x228] ss:$92 sps:$4 sm:$0xff]   ;;  %v3795_v35 = vld [vmem:[%s5686_s5 + $0x2e0] ss:$92 sps:$4 sm:$0xff]  }
   0xc   :  { %v3797_v34 = vld [vmem:[%s5686_s5 + $0x2e4] ss:$92 sps:$4 sm:$0xff]   ;;  %v3803_v36 = vld [vmem:[%s5686_s5 + $0x39c] ss:$92 sps:$4 sm:$0xff]   ;;  %v3809_v38 = vld [vmem:[%s5686_s5 + $0x454] ss:$92 sps:$4 sm:$0xff]  }
   0xd   :  { %226 = vmatpush1.bf16.msra.mxu1 %v3755_v13  ;;  %v3801_v37 = vld [vmem:[%s5686_s5 + $0x398] ss:$92 sps:$4 sm:$0xff]   ;;  %v3807_v39 = vld [vmem:[%s5686_s5 + $0x450] ss:$92 sps:$4 sm:$0xff]   ;;  %v3813_v41 = vld [vmem:[%s5686_s5 + $0x508] ss:$92 sps:$4 sm:$0xff]  }
   0xe   :  { %3734 = vmatpush3.bf16.msra.mxu0 %v64_v6  ;;  %227 = vmatprep.subr.bf16.mxu1 %v3756_v14  ;;  %v3815_v40 = vld [vmem:[%s5686_s5 + $0x50c] ss:$92 sps:$4 sm:$0xff]   ;;  %v36_v42 = vld [vmem:[%s5687_s2] sm:$0x1]  ;;  %v3788_v57 = vld [vmem:[%s5686_s5 + $0x17c] ss:$92 sps:$4 sm:$0xff]  }
   0xf   :  { %2637 = vmatprep.subr.bf16.mxu0 %v3773_v26  ;;  %v3774_v52 = vld [vmem:[%s5686_s5 + $0x8] ss:$92 sps:$4 sm:$0xff]   ;;  %v3780_v56 = vld [vmem:[%s5686_s5 + $0xc0] ss:$92 sps:$4 sm:$0xff]   ;;  %v3786_v58 = vld [vmem:[%s5686_s5 + $0x178] ss:$92 sps:$4 sm:$0xff]  }
  0x10   :  { %v3782_v53 = vld [vmem:[%s5686_s5 + $0xc4] ss:$92 sps:$4 sm:$0xff]   ;;  %v3794_v59 = vld [vmem:[%s5686_s5 + $0x234] ss:$92 sps:$4 sm:$0xff]   ;;  %v3800_v61 = vld [vmem:[%s5686_s5 + $0x2ec] ss:$92 sps:$4 sm:$0xff]  }
  0x11   :  { %3736 = vmatmul.mubr.msk.bf16.vlgmr.msra.gmra.mrb[0].mxu0 %vm58_vm2, %v28_v7  ;;  %228 = vmatpush1.bf16.msra.mxu1 %v3758_v15  ;;  %v3792_v60 = vld [vmem:[%s5686_s5 + $0x230] ss:$92 sps:$4 sm:$0xff]   ;;  %v3798_v62 = vld [vmem:[%s5686_s5 + $0x2e8] ss:$92 sps:$4 sm:$0xff]   ;;  %v3804_v0 = vld [vmem:[%s5686_s5 + $0x3a0] ss:$92 sps:$4 sm:$0xff]  }
  0x12   :  { %229 = vmatprep.subr.bf16.mxu1 %v3759_v16  ;;  %2638 = vmatpush1.bf16.msra.mxu0 %v3771_v25  ;;  %v3806_v63 = vld [vmem:[%s5686_s5 + $0x3a4] ss:$92 sps:$4 sm:$0xff]   ;;  %v3812_v1 = vld [vmem:[%s5686_s5 + $0x45c] ss:$92 sps:$4 sm:$0xff]   ;;  %v3818_v3 = vld [vmem:[%s5686_s5 + $0x514] ss:$92 sps:$4 sm:$0xff]  }
  0x13   :  { %2639 = vmatprep.subr.bf16.mxu0 %v3779_v28  ;;  %v3810_v2 = vld [vmem:[%s5686_s5 + $0x458] ss:$92 sps:$4 sm:$0xff]   ;;  %v3816_v4 = vld [vmem:[%s5686_s5 + $0x510] ss:$92 sps:$4 sm:$0xff]   ;;  %v3821_v5 = vld [vmem:[%s5686_s5 + $0x5c4] ss:$92 sps:$4 sm:$0xff]  }
  0x14   :  { %v3824_v6 = vld [vmem:[%s5686_s5 + $0x5cc] ss:$92 sps:$4 sm:$0xff]   ;;  %v3819_v7 = vld [vmem:[%s5686_s5 + $0x5c0] ss:$92 sps:$4 sm:$0xff]   ;;  %v3825_v11 = vld [vmem:[%s5686_s5 + $0x678] ss:$92 sps:$4 sm:$0xff]  }
  0x15   :  { %230 = vmatpush1.bf16.msra.mxu1 %v3761_v17  ;;  %v3822_v8 = vld [vmem:[%s5686_s5 + $0x5c8] ss:$92 sps:$4 sm:$0xff]   ;;  %v3827_v9 = vld [vmem:[%s5686_s5 + $0x67c] ss:$92 sps:$4 sm:$0xff]   ;;  %v3833_v13 = vld [vmem:[%s5686_s5 + $0x734] ss:$92 sps:$4 sm:$0xff]  }
  0x16   :  { %231 = vmatprep.subr.bf16.mxu1 %v3762_v18  ;;  %2640 = vmatpush1.bf16.msra.mxu0 %v3777_v29  ;;  %v3830_v10 = vld [vmem:[%s5686_s5 + $0x684] ss:$92 sps:$4 sm:$0xff]   ;;  %v3836_v14 = vld [vmem:[%s5686_s5 + $0x73c] ss:$92 sps:$4 sm:$0xff]   ;;  %v3831_v15 = vld [vmem:[%s5686_s5 + $0x730] ss:$92 sps:$4 sm:$0xff]  }
  0x17   :  { %2641 = vmatprep.subr.bf16.mxu0 %v3785_v30  ;;  %v3828_v12 = vld [vmem:[%s5686_s5 + $0x680] ss:$92 sps:$4 sm:$0xff]   ;;  %v3834_v16 = vld [vmem:[%s5686_s5 + $0x738] ss:$92 sps:$4 sm:$0xff]   ;;  %v3839_v17 = vld [vmem:[%s5686_s5 + $0x7ec] ss:$92 sps:$4 sm:$0xff]  }
  0x18   :  { %v3842_v18 = vld [vmem:[%s5686_s5 + $0x7f4] ss:$92 sps:$4 sm:$0xff]   ;;  %v3848_v22 = vld [vmem:[%s5686_s5 + $0x8ac] ss:$92 sps:$4 sm:$0xff]   ;;  %v3851_v25 = vld [vmem:[%s5686_s5 + $0x95c] ss:$92 sps:$4 sm:$0xff]  }
  0x19   :  { %232 = vmatpush1.bf16.msra.mxu1 %v3764_v19  ;;  %v3837_v19 = vld [vmem:[%s5686_s5 + $0x7e8] ss:$92 sps:$4 sm:$0xff]   ;;  %v3852_v28 = vld [vmem:[%s5686_s5 + $0x960] ss:$92 sps:$4 sm:$0xff]   ;;  %v3857_v29 = vld [vmem:[%s5686_s5 + $0xa14] ss:$92 sps:$4 sm:$0xff]  }
  0x1a   :  { %233 = vmatprep.subr.bf16.mxu1 %v3765_v20  ;;  %2642 = vmatpush1.bf16.msra.mxu0 %v3783_v31  ;;  %v3840_v20 = vld [vmem:[%s5686_s5 + $0x7f0] ss:$92 sps:$4 sm:$0xff]   ;;  %v3854_v26 = vld [vmem:[%s5686_s5 + $0x964] ss:$92 sps:$4 sm:$0xff]   ;;  %v3860_v30 = vld [vmem:[%s5686_s5 + $0xa1c] ss:$92 sps:$4 sm:$0xff]  }
  0x1b   :  { %2643 = vmatprep.subr.bf16.mxu0 %v3791_v32  ;;  %v3855_v31 = vld [vmem:[%s5686_s5 + $0xa10] ss:$92 sps:$4 sm:$0xff]   ;;  %v3858_v32 = vld [vmem:[%s5686_s5 + $0xa18] ss:$92 sps:$4 sm:$0xff]  }
  0x1d   :  { %234 = vmatpush1.bf16.msra.mxu1 %v3767_v21  ;;  %v3845_v21 = vld [vmem:[%s5686_s5 + $0x8a4] ss:$92 sps:$4 sm:$0xff]  }
  0x1e   :  { %235 = vmatprep.subr.bf16.mxu1 %v3768_v23  ;;  %2644 = vmatpush1.bf16.msra.mxu0 %v3789_v33  ;;  %v3843_v23 = vld [vmem:[%s5686_s5 + $0x8a0] ss:$92 sps:$4 sm:$0xff]   ;;  %v3863_v33 = vld [vmem:[%s5686_s5 + $0xacc] ss:$92 sps:$4 sm:$0xff]  }
  0x1f   :  { %2645 = vmatprep.subr.bf16.mxu0 %v3797_v34  ;;  %v3866_v34 = vld [vmem:[%s5686_s5 + $0xad4] ss:$92 sps:$4 sm:$0xff]  }
  0x21   :  { %236 = vmatpush1.bf16.msra.mxu1 %v3770_v24  ;;  %v3846_v24 = vld [vmem:[%s5686_s5 + $0x8a8] ss:$92 sps:$4 sm:$0xff]  }
  0x22   :  { %2678 = vmatprep.subr.bf16.mxu1 %v3776_v27  ;;  %2646 = vmatpush1.bf16.msra.mxu0 %v3795_v35  ;;  %v3849_v27 = vld [vmem:[%s5686_s5 + $0x958] ss:$92 sps:$4 sm:$0xff]   ;;  %v3861_v35 = vld [vmem:[%s5686_s5 + $0xac8] ss:$92 sps:$4 sm:$0xff]  }
  0x23   :  { %2647 = vmatprep.subr.bf16.mxu0 %v3803_v36  ;;  %v3864_v36 = vld [vmem:[%s5686_s5 + $0xad0] ss:$92 sps:$4 sm:$0xff]  }
  0x26   :  { %2648 = vmatpush1.bf16.msra.mxu0 %v3801_v37  ;;  %v3869_v37 = vld [vmem:[%s5686_s5 + $0x14] ss:$92 sps:$4 sm:$0xff]  }
  0x27   :  { %2649 = vmatprep.subr.bf16.mxu0 %v3809_v38  ;;  %v3872_v38 = vld [vmem:[%s5686_s5 + $0x1c] ss:$92 sps:$4 sm:$0xff]  }
  0x2a   :  { %2650 = vmatpush1.bf16.msra.mxu0 %v3807_v39  ;;  %v211_v39 = vlaneseq }
  0x2b   :  { %2651 = vmatprep.subr.bf16.mxu0 %v3815_v40 }
  0x2c   :  { %v4636_v40 = vshrl.u32 %v211_v39, 7  ;;  %vm3304_vm3 = vcmp.lt.s32.totalorder %v211_v39, 868 }
  0x2e   :  { %2652 = vmatpush1.bf16.msra.mxu0 %v3813_v41  ;;  %v4639_v41 = vsub.s32 0, %v4636_v40 }
  0x2f   :  { %2653 = vmatprep.subr.bf16.mxu0 %v3821_v5  ;;  %v3876_v5 = vld [vmem:[%s5686_s5 + $0xd0] ss:$92 sps:$4 sm:$0xff]  }
  0x32   :  { %2654 = vmatpush1.bf16.msra.mxu0 %v3819_v7  ;;  %v3884_v7 = vld [vmem:[%s5686_s5 + $0x18c] ss:$92 sps:$4 sm:$0xff]  }
  0x33   :  { %2655 = vmatprep.subr.bf16.mxu0 %v3827_v9  ;;  %v3882_v9 = vld [vmem:[%s5686_s5 + $0x188] ss:$92 sps:$4 sm:$0xff]  }
  0x36   :  { %2656 = vmatpush1.bf16.msra.mxu0 %v3825_v11  ;;  %v3890_v11 = vld [vmem:[%s5686_s5 + $0x244] ss:$92 sps:$4 sm:$0xff]  }
  0x37   :  { %2657 = vmatprep.subr.bf16.mxu0 %v3833_v13  ;;  %v3888_v13 = vld [vmem:[%s5686_s5 + $0x240] ss:$92 sps:$4 sm:$0xff]  }
  0x3a   :  { %2658 = vmatpush1.bf16.msra.mxu0 %v3831_v15  ;;  %v3896_v15 = vld [vmem:[%s5686_s5 + $0x2fc] ss:$92 sps:$4 sm:$0xff]  }
  0x3b   :  { %2659 = vmatprep.subr.bf16.mxu0 %v3839_v17  ;;  %v3894_v17 = vld [vmem:[%s5686_s5 + $0x2f8] ss:$92 sps:$4 sm:$0xff]  }
  0x3e   :  { %2660 = vmatpush1.bf16.msra.mxu0 %v3837_v19  ;;  %v3902_v19 = vld [vmem:[%s5686_s5 + $0x3b4] ss:$92 sps:$4 sm:$0xff]  }
  0x3f   :  { %2661 = vmatprep.subr.bf16.mxu0 %v3845_v21  ;;  %v3900_v21 = vld [vmem:[%s5686_s5 + $0x3b0] ss:$92 sps:$4 sm:$0xff]  }
  0x42   :  { %2662 = vmatpush1.bf16.msra.mxu0 %v3843_v23  ;;  %v3908_v23 = vld [vmem:[%s5686_s5 + $0x46c] ss:$92 sps:$4 sm:$0xff]  }
  0x43   :  { %2663 = vmatprep.subr.bf16.mxu0 %v3851_v25  ;;  %v3906_v25 = vld [vmem:[%s5686_s5 + $0x468] ss:$92 sps:$4 sm:$0xff]  }
  0x46   :  { %2664 = vmatpush1.bf16.msra.mxu0 %v3849_v27  ;;  %v3914_v27 = vld [vmem:[%s5686_s5 + $0x524] ss:$92 sps:$4 sm:$0xff]  }
  0x47   :  { %2665 = vmatprep.subr.bf16.mxu0 %v3857_v29  ;;  %v3912_v29 = vld [vmem:[%s5686_s5 + $0x520] ss:$92 sps:$4 sm:$0xff]  }
  0x4a   :  { %2666 = vmatpush1.bf16.msra.mxu0 %v3855_v31  ;;  %v3920_v31 = vld [vmem:[%s5686_s5 + $0x5dc] ss:$92 sps:$4 sm:$0xff]  }
  0x4b   :  { %2667 = vmatprep.subr.bf16.mxu0 %v3863_v33  ;;  %v3918_v33 = vld [vmem:[%s5686_s5 + $0x5d8] ss:$92 sps:$4 sm:$0xff]  }
  0x4e   :  { %2668 = vmatpush1.bf16.msra.mxu0 %v3861_v35  ;;  %v3926_v35 = vld [vmem:[%s5686_s5 + $0x694] ss:$92 sps:$4 sm:$0xff]  }
  0x4f   :  { %2719 = vmatprep.subr.bf16.mxu0 %v3869_v37  ;;  %v3924_v37 = vld [vmem:[%s5686_s5 + $0x690] ss:$92 sps:$4 sm:$0xff]  }
  0xe4   :  { %v100_v43 = vpop.f32.mrb[0].mxu0 }
  0xe5   :  { %v101_v44 = vadd.f32 %v100_v43, %v36_v42  ;;  %v3737_v45 = vpop.f32.mrb[1].mxu0  ;;  %v129_v42 = vld [vmem:[%s5688_s4] sm:$0x3]  ;;  %v4645_v43 = vsub.s32 1, %v4636_v40 }
  0xe6   :  { %v103_v46 = vpop.f32.mrb[2].mxu0 }
  0xe7   :  { %v106_v47 = vsub.f32 0.0, %v101_v44  ;;  %v3738_v48 = vpop.f32.mrb[3].mxu0  ;;  %v214_v44 = vrot.slane %v129_v42, %v4639_v41  ;;  %v218_v45 = vrot.slane %v129_v42, %v4645_v43  ;;  %v3932_v42 = vld [vmem:[%s5686_s5 + $0x74c] ss:$92 sps:$4 sm:$0xff]  }
  0xe9   :  { %v107_v49 = vmul.f32 1.442695, %v106_v47 }
  0xeb   :  { %4315 = vpow2.f32 %v107_v49 }
  0xf5   :  { %v4316_v50 = vpop.eup %4315 }
  0xf6   :  { %v109_v51 = vadd.f32 1.0, %v4316_v50 }
  0xf8   :  { %4317 = vrcp.f32 %v109_v51 }
 0x102   :  { %v4318_v54 = vpop.eup %4317 }
 0x103   :  { %v112_v55 = vpack.c.bf16 %v4318_v54, %v4318_v54 }
 0x105   :  { %254 = vmatmul.mubr.bf16.vlgmr.msra.gmra.mrb[0].mxu1 %v112_v55 }
 0x106   :  { %2679 = vmatpush1.bf16.msra.mxu1 %v3774_v52 }
 0x107   :  { %2680 = vmatprep.subr.bf16.mxu1 %v3782_v53 }
 0x10a   :  { %2681 = vmatpush1.bf16.msra.mxu1 %v3780_v56 }
 0x10b   :  { %2682 = vmatprep.subr.bf16.mxu1 %v3788_v57 }
 0x10e   :  { %2683 = vmatpush1.bf16.msra.mxu1 %v3786_v58 }
 0x10f   :  { %2684 = vmatprep.subr.bf16.mxu1 %v3794_v59 }
 0x112   :  { %2685 = vmatpush1.bf16.msra.mxu1 %v3792_v60 }
 0x113   :  { %2686 = vmatprep.subr.bf16.mxu1 %v3800_v61 }
 0x116   :  { %2687 = vmatpush1.bf16.msra.mxu1 %v3798_v62 }
 0x117   :  { %2688 = vmatprep.subr.bf16.mxu1 %v3806_v63  ;;  %v3867_v63 = vld [vmem:[%s5686_s5 + $0x10] ss:$92 sps:$4 sm:$0xff]  }
 0x11a   :  { %2689 = vmatpush1.bf16.msra.mxu1 %v3804_v0  ;;  %v3870_v0 = vld [vmem:[%s5686_s5 + $0x18] ss:$92 sps:$4 sm:$0xff]  }
 0x11b   :  { %2690 = vmatprep.subr.bf16.mxu1 %v3812_v1 }
 0x11e   :  { %2691 = vmatpush1.bf16.msra.mxu1 %v3810_v2  ;;  %v3875_v2 = vld [vmem:[%s5686_s5 + $0xcc] ss:$92 sps:$4 sm:$0xff]  }
 0x11f   :  { %2692 = vmatprep.subr.bf16.mxu1 %v3818_v3  ;;  %v3878_v3 = vld [vmem:[%s5686_s5 + $0xd4] ss:$92 sps:$4 sm:$0xff]  }
 0x122   :  { %2693 = vmatpush1.bf16.msra.mxu1 %v3816_v4  ;;  %v3873_v4 = vld [vmem:[%s5686_s5 + $0xc8] ss:$92 sps:$4 sm:$0xff]  }
 0x123   :  { %2694 = vmatprep.subr.bf16.mxu1 %v3824_v6  ;;  %v3881_v6 = vld [vmem:[%s5686_s5 + $0x184] ss:$92 sps:$4 sm:$0xff]  }
 0x126   :  { %2695 = vmatpush1.bf16.msra.mxu1 %v3822_v8  ;;  %v3879_v8 = vld [vmem:[%s5686_s5 + $0x180] ss:$92 sps:$4 sm:$0xff]  }
 0x127   :  { %2696 = vmatprep.subr.bf16.mxu1 %v3830_v10  ;;  %v3887_v10 = vld [vmem:[%s5686_s5 + $0x23c] ss:$92 sps:$4 sm:$0xff]  }
 0x12a   :  { %2697 = vmatpush1.bf16.msra.mxu1 %v3828_v12  ;;  %v3885_v12 = vld [vmem:[%s5686_s5 + $0x238] ss:$92 sps:$4 sm:$0xff]  }
 0x12b   :  { %2698 = vmatprep.subr.bf16.mxu1 %v3836_v14  ;;  %v3893_v14 = vld [vmem:[%s5686_s5 + $0x2f4] ss:$92 sps:$4 sm:$0xff]  }
 0x12e   :  { %2699 = vmatpush1.bf16.msra.mxu1 %v3834_v16  ;;  %v3891_v16 = vld [vmem:[%s5686_s5 + $0x2f0] ss:$92 sps:$4 sm:$0xff]  }
 0x12f   :  { %2700 = vmatprep.subr.bf16.mxu1 %v3842_v18  ;;  %v3899_v18 = vld [vmem:[%s5686_s5 + $0x3ac] ss:$92 sps:$4 sm:$0xff]  }
 0x132   :  { %2701 = vmatpush1.bf16.msra.mxu1 %v3840_v20  ;;  %v3897_v20 = vld [vmem:[%s5686_s5 + $0x3a8] ss:$92 sps:$4 sm:$0xff]  }
 0x133   :  { %2702 = vmatprep.subr.bf16.mxu1 %v3848_v22  ;;  %v3905_v22 = vld [vmem:[%s5686_s5 + $0x464] ss:$92 sps:$4 sm:$0xff]  }
 0x136   :  { %2703 = vmatpush1.bf16.msra.mxu1 %v3846_v24  ;;  %v3903_v24 = vld [vmem:[%s5686_s5 + $0x460] ss:$92 sps:$4 sm:$0xff]  }
 0x137   :  { %2704 = vmatprep.subr.bf16.mxu1 %v3854_v26  ;;  %v3911_v26 = vld [vmem:[%s5686_s5 + $0x51c] ss:$92 sps:$4 sm:$0xff]  }
 0x13a   :  { %2705 = vmatpush1.bf16.msra.mxu1 %v3852_v28  ;;  %v3909_v28 = vld [vmem:[%s5686_s5 + $0x518] ss:$92 sps:$4 sm:$0xff]  }
 0x13b   :  { %2706 = vmatprep.subr.bf16.mxu1 %v3860_v30  ;;  %v3917_v30 = vld [vmem:[%s5686_s5 + $0x5d4] ss:$92 sps:$4 sm:$0xff]  }
 0x13e   :  { %2707 = vmatpush1.bf16.msra.mxu1 %v3858_v32  ;;  %v3915_v32 = vld [vmem:[%s5686_s5 + $0x5d0] ss:$92 sps:$4 sm:$0xff]  }
 0x13f   :  { %2708 = vmatprep.subr.bf16.mxu1 %v3866_v34  ;;  %v3923_v34 = vld [vmem:[%s5686_s5 + $0x68c] ss:$92 sps:$4 sm:$0xff]  }
 0x142   :  { %2709 = vmatpush1.bf16.msra.mxu1 %v3864_v36  ;;  %v3921_v36 = vld [vmem:[%s5686_s5 + $0x688] ss:$92 sps:$4 sm:$0xff]  }
 0x143   :  { %2760 = vmatprep.subr.bf16.mxu1 %v3872_v38  ;;  %v3929_v38 = vld [vmem:[%s5686_s5 + $0x744] ss:$92 sps:$4 sm:$0xff]  }
 0x1d8   :  { %v255_v46 = vpop.f32.mrb[0].mxu1 }
 0x1d9   :  { %v256_v47 = vadd.f32 %v255_v46, %v214_v44  ;;  %v257_v48 = vpop.f32.mrb[1].mxu1  ;;  %v3927_v44 = vld [vmem:[%s5686_s5 + $0x740] ss:$92 sps:$4 sm:$0xff]  }
 0x1da   :  { %v258_v49 = vadd.f32 %v257_v48, %v218_v45  ;;  %v259_v50 = vpop.f32.mrb[2].mxu1  ;;  %v3930_v45 = vld [vmem:[%s5686_s5 + $0x748] ss:$92 sps:$4 sm:$0xff]   ;;  %v3935_v46 = vld [vmem:[%s5686_s5 + $0x7fc] ss:$92 sps:$4 sm:$0xff]  }
 0x1db   :  { %v262_v51 = vsub.f32 0.0, %v256_v47  ;;  %v260_v52 = vpop.f32.mrb[3].mxu1  ;;  %v3938_v47 = vld [vmem:[%s5686_s5 + $0x804] ss:$92 sps:$4 sm:$0xff]   ;;  %v3933_v48 = vld [vmem:[%s5686_s5 + $0x7f8] ss:$92 sps:$4 sm:$0xff]  }
 0x1dc   :  { %v263_v53 = vsub.f32 0.0, %v258_v49  ;;  %v3936_v49 = vld [vmem:[%s5686_s5 + $0x800] ss:$92 sps:$4 sm:$0xff]   ;;  %v3941_v50 = vld [vmem:[%s5686_s5 + $0x8b4] ss:$92 sps:$4 sm:$0xff]  }
 0x1dd   :  { %v264_v54 = vmul.f32 1.442695, %v262_v51  ;;  %v3944_v51 = vld [vmem:[%s5686_s5 + $0x8bc] ss:$92 sps:$4 sm:$0xff]   ;;  %v3939_v52 = vld [vmem:[%s5686_s5 + $0x8b0] ss:$92 sps:$4 sm:$0xff]  }
 0x1de   :  { %v266_v55 = vmul.f32 1.442695, %v263_v53  ;;  %v3942_v53 = vld [vmem:[%s5686_s5 + $0x8b8] ss:$92 sps:$4 sm:$0xff]  }
 0x1df   :  { %4319 = vpow2.f32 %v264_v54  ;;  %v3947_v54 = vld [vmem:[%s5686_s5 + $0x96c] ss:$92 sps:$4 sm:$0xff]  }
 0x1e0   :  { %4321 = vpow2.f32 %v266_v55  ;;  %v3950_v55 = vld [vmem:[%s5686_s5 + $0x974] ss:$92 sps:$4 sm:$0xff]  }
 0x1e9   :  { %v4320_v56 = vpop.eup %4319 }
 0x1ea   :  { %v4322_v57 = vpop.eup %4321  ;;  %v268_v58 = vadd.f32 1.0, %v4320_v56  ;;  %v3945_v56 = vld [vmem:[%s5686_s5 + $0x968] ss:$92 sps:$4 sm:$0xff]  }
 0x1eb   :  { %v269_v59 = vadd.f32 1.0, %v4322_v57  ;;  %v3948_v57 = vld [vmem:[%s5686_s5 + $0x970] ss:$92 sps:$4 sm:$0xff]  }
 0x1ec   :  { %4323 = vrcp.f32 %v268_v58  ;;  %v3953_v58 = vld [vmem:[%s5686_s5 + $0xa24] ss:$92 sps:$4 sm:$0xff]  }
 0x1ed   :  { %4325 = vrcp.f32 %v269_v59  ;;  %v3956_v59 = vld [vmem:[%s5686_s5 + $0xa2c] ss:$92 sps:$4 sm:$0xff]  }
 0x1f6   :  { %v4324_v60 = vpop.eup %4323 }
 0x1f7   :  { %v4326_v61 = vpop.eup %4325  ;;  %v4657_v1 = vpack.c.bf16 %v4324_v60, %v4324_v60  ;;  %v3951_v60 = vld [vmem:[%s5686_s5 + $0xa20] ss:$92 sps:$4 sm:$0xff]  }
 0x1f8   :  { %v4649_v62 = vpack.c.bf16 %v4326_v61, %v4326_v61  ;;  %v3954_v61 = vld [vmem:[%s5686_s5 + $0xa28] ss:$92 sps:$4 sm:$0xff]  }
 0x1fa   :  { %2669 = vmatprep.mubr.bf16.mxu0 %v4649_v62  ;;  %2710 = vmatprep.mubr.bf16.mxu1 %v4649_v62 }
 0x1fb   :  { %2670 = vmatmul.mubr.bf16.vlgmr.msra.gmra.mrb[4].mxu0 %v4657_v1  ;;  %2711 = vmatmul.mubr.bf16.vlgmr.msra.gmra.mrb[4].mxu1 %v4657_v1 }
 0x1fc   :  { %2720 = vmatpush1.bf16.msra.mxu0 %v3867_v63  ;;  %2761 = vmatpush1.bf16.msra.mxu1 %v3870_v0  ;;  %v3959_v63 = vld [vmem:[%s5686_s5 + $0xadc] ss:$92 sps:$4 sm:$0xff]   ;;  %v3962_v0 = vld [vmem:[%s5686_s5 + $0xae4] ss:$92 sps:$4 sm:$0xff]  }
 0x1fd   :  { %2751 = vmatprep.mubr.bf16.mxu0 %v4649_v62  ;;  %2792 = vmatprep.mubr.bf16.mxu1 %v4649_v62 }
 0x1fe   :  { %2721 = vmatprep.subr.bf16.mxu0 %v3875_v2  ;;  %2762 = vmatprep.subr.bf16.mxu1 %v3878_v3  ;;  %v3957_v2 = vld [vmem:[%s5686_s5 + $0xad8] ss:$92 sps:$4 sm:$0xff]   ;;  %v3960_v3 = vld [vmem:[%s5686_s5 + $0xae0] ss:$92 sps:$4 sm:$0xff]  }
 0x200   :  { %2722 = vmatpush1.bf16.msra.mxu0 %v3873_v4  ;;  %2763 = vmatpush1.bf16.msra.mxu1 %v3876_v5  ;;  %v3965_v4 = vld [vmem:[%s5686_s5 + $0x24] ss:$92 sps:$4 sm:$0xff]   ;;  %v3968_v5 = vld [vmem:[%s5686_s5 + $0x2c] ss:$92 sps:$4 sm:$0xff]  }
 0x201   :  { %2723 = vmatprep.subr.bf16.mxu0 %v3881_v6  ;;  %2764 = vmatprep.subr.bf16.mxu1 %v3884_v7  ;;  %v3963_v6 = vld [vmem:[%s5686_s5 + $0x20] ss:$92 sps:$4 sm:$0xff]   ;;  %v3966_v7 = vld [vmem:[%s5686_s5 + $0x28] ss:$92 sps:$4 sm:$0xff]  }
 0x204   :  { %2724 = vmatpush1.bf16.msra.mxu0 %v3879_v8  ;;  %2765 = vmatpush1.bf16.msra.mxu1 %v3882_v9  ;;  %v3971_v8 = vld [vmem:[%s5686_s5 + $0xdc] ss:$92 sps:$4 sm:$0xff]   ;;  %v3974_v9 = vld [vmem:[%s5686_s5 + $0xe4] ss:$92 sps:$4 sm:$0xff]  }
 0x205   :  { %2725 = vmatprep.subr.bf16.mxu0 %v3887_v10  ;;  %2766 = vmatprep.subr.bf16.mxu1 %v3890_v11  ;;  %v3969_v10 = vld [vmem:[%s5686_s5 + $0xd8] ss:$92 sps:$4 sm:$0xff]   ;;  %v3972_v11 = vld [vmem:[%s5686_s5 + $0xe0] ss:$92 sps:$4 sm:$0xff]  }
 0x208   :  { %2726 = vmatpush1.bf16.msra.mxu0 %v3885_v12  ;;  %2767 = vmatpush1.bf16.msra.mxu1 %v3888_v13  ;;  %v3977_v12 = vld [vmem:[%s5686_s5 + $0x194] ss:$92 sps:$4 sm:$0xff]   ;;  %v3980_v13 = vld [vmem:[%s5686_s5 + $0x19c] ss:$92 sps:$4 sm:$0xff]  }
 0x209   :  { %2727 = vmatprep.subr.bf16.mxu0 %v3893_v14  ;;  %2768 = vmatprep.subr.bf16.mxu1 %v3896_v15  ;;  %v3975_v14 = vld [vmem:[%s5686_s5 + $0x190] ss:$92 sps:$4 sm:$0xff]   ;;  %v3978_v15 = vld [vmem:[%s5686_s5 + $0x198] ss:$92 sps:$4 sm:$0xff]  }
 0x20c   :  { %2728 = vmatpush1.bf16.msra.mxu0 %v3891_v16  ;;  %2769 = vmatpush1.bf16.msra.mxu1 %v3894_v17  ;;  %v3983_v16 = vld [vmem:[%s5686_s5 + $0x24c] ss:$92 sps:$4 sm:$0xff]   ;;  %v3986_v17 = vld [vmem:[%s5686_s5 + $0x254] ss:$92 sps:$4 sm:$0xff]  }
 0x20d   :  { %2729 = vmatprep.subr.bf16.mxu0 %v3899_v18  ;;  %2770 = vmatprep.subr.bf16.mxu1 %v3902_v19  ;;  %v3981_v18 = vld [vmem:[%s5686_s5 + $0x248] ss:$92 sps:$4 sm:$0xff]   ;;  %v3984_v19 = vld [vmem:[%s5686_s5 + $0x250] ss:$92 sps:$4 sm:$0xff]  }
 0x210   :  { %2730 = vmatpush1.bf16.msra.mxu0 %v3897_v20  ;;  %2771 = vmatpush1.bf16.msra.mxu1 %v3900_v21  ;;  %v3989_v20 = vld [vmem:[%s5686_s5 + $0x304] ss:$92 sps:$4 sm:$0xff]   ;;  %v3992_v21 = vld [vmem:[%s5686_s5 + $0x30c] ss:$92 sps:$4 sm:$0xff]  }
 0x211   :  { %2731 = vmatprep.subr.bf16.mxu0 %v3905_v22  ;;  %2772 = vmatprep.subr.bf16.mxu1 %v3908_v23  ;;  %v3987_v22 = vld [vmem:[%s5686_s5 + $0x300] ss:$92 sps:$4 sm:$0xff]   ;;  %v3990_v23 = vld [vmem:[%s5686_s5 + $0x308] ss:$92 sps:$4 sm:$0xff]  }
 0x214   :  { %2732 = vmatpush1.bf16.msra.mxu0 %v3903_v24  ;;  %2773 = vmatpush1.bf16.msra.mxu1 %v3906_v25  ;;  %v3995_v24 = vld [vmem:[%s5686_s5 + $0x3bc] ss:$92 sps:$4 sm:$0xff]   ;;  %v3998_v25 = vld [vmem:[%s5686_s5 + $0x3c4] ss:$92 sps:$4 sm:$0xff]  }
 0x215   :  { %2733 = vmatprep.subr.bf16.mxu0 %v3911_v26  ;;  %2774 = vmatprep.subr.bf16.mxu1 %v3914_v27  ;;  %v3993_v26 = vld [vmem:[%s5686_s5 + $0x3b8] ss:$92 sps:$4 sm:$0xff]   ;;  %v3996_v27 = vld [vmem:[%s5686_s5 + $0x3c0] ss:$92 sps:$4 sm:$0xff]  }
 0x218   :  { %2734 = vmatpush1.bf16.msra.mxu0 %v3909_v28  ;;  %2775 = vmatpush1.bf16.msra.mxu1 %v3912_v29  ;;  %v4001_v28 = vld [vmem:[%s5686_s5 + $0x474] ss:$92 sps:$4 sm:$0xff]   ;;  %v4004_v29 = vld [vmem:[%s5686_s5 + $0x47c] ss:$92 sps:$4 sm:$0xff]  }
 0x219   :  { %2735 = vmatprep.subr.bf16.mxu0 %v3917_v30  ;;  %2776 = vmatprep.subr.bf16.mxu1 %v3920_v31  ;;  %v3999_v30 = vld [vmem:[%s5686_s5 + $0x470] ss:$92 sps:$4 sm:$0xff]   ;;  %v4002_v31 = vld [vmem:[%s5686_s5 + $0x478] ss:$92 sps:$4 sm:$0xff]  }
 0x21c   :  { %2736 = vmatpush1.bf16.msra.mxu0 %v3915_v32  ;;  %2777 = vmatpush1.bf16.msra.mxu1 %v3918_v33  ;;  %v4007_v32 = vld [vmem:[%s5686_s5 + $0x52c] ss:$92 sps:$4 sm:$0xff]   ;;  %v4010_v33 = vld [vmem:[%s5686_s5 + $0x534] ss:$92 sps:$4 sm:$0xff]  }
 0x21d   :  { %2737 = vmatprep.subr.bf16.mxu0 %v3923_v34  ;;  %2778 = vmatprep.subr.bf16.mxu1 %v3926_v35  ;;  %v4005_v34 = vld [vmem:[%s5686_s5 + $0x528] ss:$92 sps:$4 sm:$0xff]   ;;  %v4008_v35 = vld [vmem:[%s5686_s5 + $0x530] ss:$92 sps:$4 sm:$0xff]  }
 0x220   :  { %2738 = vmatpush1.bf16.msra.mxu0 %v3921_v36  ;;  %2779 = vmatpush1.bf16.msra.mxu1 %v3924_v37  ;;  %v4013_v36 = vld [vmem:[%s5686_s5 + $0x5e4] ss:$92 sps:$4 sm:$0xff]   ;;  %v4016_v37 = vld [vmem:[%s5686_s5 + $0x5ec] ss:$92 sps:$4 sm:$0xff]  }
 0x221   :  { %2739 = vmatprep.subr.bf16.mxu0 %v3929_v38  ;;  %2780 = vmatprep.subr.bf16.mxu1 %v3932_v42  ;;  %v4011_v38 = vld [vmem:[%s5686_s5 + $0x5e0] ss:$92 sps:$4 sm:$0xff]   ;;  %v4014_v42 = vld [vmem:[%s5686_s5 + $0x5e8] ss:$92 sps:$4 sm:$0xff]  }
 0x224   :  { %2740 = vmatpush1.bf16.msra.mxu0 %v3927_v44  ;;  %2781 = vmatpush1.bf16.msra.mxu1 %v3930_v45  ;;  %v4019_v44 = vld [vmem:[%s5686_s5 + $0x69c] ss:$92 sps:$4 sm:$0xff]   ;;  %v4022_v45 = vld [vmem:[%s5686_s5 + $0x6a4] ss:$92 sps:$4 sm:$0xff]  }
 0x225   :  { %2741 = vmatprep.subr.bf16.mxu0 %v3935_v46  ;;  %2782 = vmatprep.subr.bf16.mxu1 %v3938_v47  ;;  %v4017_v46 = vld [vmem:[%s5686_s5 + $0x698] ss:$92 sps:$4 sm:$0xff]   ;;  %v4020_v47 = vld [vmem:[%s5686_s5 + $0x6a0] ss:$92 sps:$4 sm:$0xff]  }
 0x228   :  { %2742 = vmatpush1.bf16.msra.mxu0 %v3933_v48  ;;  %2783 = vmatpush1.bf16.msra.mxu1 %v3936_v49  ;;  %v4025_v48 = vld [vmem:[%s5686_s5 + $0x754] ss:$92 sps:$4 sm:$0xff]   ;;  %v4028_v49 = vld [vmem:[%s5686_s5 + $0x75c] ss:$92 sps:$4 sm:$0xff]  }
 0x229   :  { %2743 = vmatprep.subr.bf16.mxu0 %v3941_v50  ;;  %2784 = vmatprep.subr.bf16.mxu1 %v3944_v51  ;;  %v4023_v50 = vld [vmem:[%s5686_s5 + $0x750] ss:$92 sps:$4 sm:$0xff]   ;;  %v4026_v51 = vld [vmem:[%s5686_s5 + $0x758] ss:$92 sps:$4 sm:$0xff]  }
 0x22c   :  { %2744 = vmatpush1.bf16.msra.mxu0 %v3939_v52  ;;  %2785 = vmatpush1.bf16.msra.mxu1 %v3942_v53  ;;  %v4031_v52 = vld [vmem:[%s5686_s5 + $0x80c] ss:$92 sps:$4 sm:$0xff]   ;;  %v4034_v53 = vld [vmem:[%s5686_s5 + $0x814] ss:$92 sps:$4 sm:$0xff]  }
 0x22d   :  { %2745 = vmatprep.subr.bf16.mxu0 %v3947_v54  ;;  %2786 = vmatprep.subr.bf16.mxu1 %v3950_v55  ;;  %v4029_v54 = vld [vmem:[%s5686_s5 + $0x808] ss:$92 sps:$4 sm:$0xff]   ;;  %v4032_v55 = vld [vmem:[%s5686_s5 + $0x810] ss:$92 sps:$4 sm:$0xff]  }
 0x230   :  { %2746 = vmatpush1.bf16.msra.mxu0 %v3945_v56  ;;  %2787 = vmatpush1.bf16.msra.mxu1 %v3948_v57  ;;  %v4037_v56 = vld [vmem:[%s5686_s5 + $0x8c4] ss:$92 sps:$4 sm:$0xff]   ;;  %v4040_v57 = vld [vmem:[%s5686_s5 + $0x8cc] ss:$92 sps:$4 sm:$0xff]  }
 0x231   :  { %2747 = vmatprep.subr.bf16.mxu0 %v3953_v58  ;;  %2788 = vmatprep.subr.bf16.mxu1 %v3956_v59  ;;  %v4035_v58 = vld [vmem:[%s5686_s5 + $0x8c0] ss:$92 sps:$4 sm:$0xff]   ;;  %v4038_v59 = vld [vmem:[%s5686_s5 + $0x8c8] ss:$92 sps:$4 sm:$0xff]  }
 0x234   :  { %2748 = vmatpush1.bf16.msra.mxu0 %v3951_v60  ;;  %2789 = vmatpush1.bf16.msra.mxu1 %v3954_v61  ;;  %v4043_v60 = vld [vmem:[%s5686_s5 + $0x97c] ss:$92 sps:$4 sm:$0xff]   ;;  %v4046_v61 = vld [vmem:[%s5686_s5 + $0x984] ss:$92 sps:$4 sm:$0xff]  }
 0x235   :  { %2749 = vmatprep.subr.bf16.mxu0 %v3959_v63  ;;  %2790 = vmatprep.subr.bf16.mxu1 %v3962_v0  ;;  %v4041_v63 = vld [vmem:[%s5686_s5 + $0x978] ss:$92 sps:$4 sm:$0xff]   ;;  %v4044_v0 = vld [vmem:[%s5686_s5 + $0x980] ss:$92 sps:$4 sm:$0xff]  }
 0x238   :  { %2750 = vmatpush1.bf16.msra.mxu0 %v3957_v2  ;;  %2791 = vmatpush1.bf16.msra.mxu1 %v3960_v3  ;;  %v4049_v2 = vld [vmem:[%s5686_s5 + $0xa34] ss:$92 sps:$4 sm:$0xff]   ;;  %v4052_v3 = vld [vmem:[%s5686_s5 + $0xa3c] ss:$92 sps:$4 sm:$0xff]  }
 0x239   :  { %2801 = vmatprep.subr.bf16.mxu0 %v3965_v4  ;;  %2842 = vmatprep.subr.bf16.mxu1 %v3968_v5  ;;  %v4047_v4 = vld [vmem:[%s5686_s5 + $0xa30] ss:$92 sps:$4 sm:$0xff]   ;;  %v4050_v5 = vld [vmem:[%s5686_s5 + $0xa38] ss:$92 sps:$4 sm:$0xff]  }
 0x23b   :  { %2752 = vmatmul.mubr.bf16.vlgmr.msra.gmra.mrb[8].mxu0 %v4657_v1  ;;  %2793 = vmatmul.mubr.bf16.vlgmr.msra.gmra.mrb[8].mxu1 %v4657_v1 }
 0x23c   :  { %2802 = vmatpush1.bf16.msra.mxu0 %v3963_v6  ;;  %2833 = vmatprep.mubr.bf16.mxu0 %v4649_v62  ;;  %v4055_v6 = vld [vmem:[%s5686_s5 + $0xaec] ss:$92 sps:$4 sm:$0xff]  }
 0x23d   :  { %2843 = vmatpush1.bf16.msra.mxu1 %v3966_v7  ;;  %2874 = vmatprep.mubr.bf16.mxu1 %v4649_v62  ;;  %v4058_v7 = vld [vmem:[%s5686_s5 + $0xaf4] ss:$92 sps:$4 sm:$0xff]  }
 0x23e   :  { %2803 = vmatprep.subr.bf16.mxu0 %v3971_v8  ;;  %2844 = vmatprep.subr.bf16.mxu1 %v3974_v9  ;;  %v4053_v8 = vld [vmem:[%s5686_s5 + $0xae8] ss:$92 sps:$4 sm:$0xff]   ;;  %v4056_v9 = vld [vmem:[%s5686_s5 + $0xaf0] ss:$92 sps:$4 sm:$0xff]  }
 0x240   :  { %2804 = vmatpush1.bf16.msra.mxu0 %v3969_v10  ;;  %v4061_v10 = vld [vmem:[%s5686_s5 + $0x34] ss:$92 sps:$4 sm:$0xff]  }
 0x241   :  { %2845 = vmatpush1.bf16.msra.mxu1 %v3972_v11  ;;  %2805 = vmatprep.subr.bf16.mxu0 %v3977_v12  ;;  %v4064_v11 = vld [vmem:[%s5686_s5 + $0x3c] ss:$92 sps:$4 sm:$0xff]   ;;  %v4059_v12 = vld [vmem:[%s5686_s5 + $0x30] ss:$92 sps:$4 sm:$0xff]  }
 0x242   :  { %2846 = vmatprep.subr.bf16.mxu1 %v3980_v13  ;;  %v4062_v13 = vld [vmem:[%s5686_s5 + $0x38] ss:$92 sps:$4 sm:$0xff]  }
 0x244   :  { %2806 = vmatpush1.bf16.msra.mxu0 %v3975_v14  ;;  %v4067_v14 = vld [vmem:[%s5686_s5 + $0xec] ss:$92 sps:$4 sm:$0xff]  }
 0x245   :  { %2847 = vmatpush1.bf16.msra.mxu1 %v3978_v15  ;;  %2807 = vmatprep.subr.bf16.mxu0 %v3983_v16  ;;  %v4070_v15 = vld [vmem:[%s5686_s5 + $0xf4] ss:$92 sps:$4 sm:$0xff]   ;;  %v4065_v16 = vld [vmem:[%s5686_s5 + $0xe8] ss:$92 sps:$4 sm:$0xff]  }
 0x246   :  { %2848 = vmatprep.subr.bf16.mxu1 %v3986_v17  ;;  %v4068_v17 = vld [vmem:[%s5686_s5 + $0xf0] ss:$92 sps:$4 sm:$0xff]  }
 0x248   :  { %2808 = vmatpush1.bf16.msra.mxu0 %v3981_v18  ;;  %v4073_v18 = vld [vmem:[%s5686_s5 + $0x1a4] ss:$92 sps:$4 sm:$0xff]  }
 0x249   :  { %2849 = vmatpush1.bf16.msra.mxu1 %v3984_v19  ;;  %2809 = vmatprep.subr.bf16.mxu0 %v3989_v20  ;;  %v4076_v19 = vld [vmem:[%s5686_s5 + $0x1ac] ss:$92 sps:$4 sm:$0xff]   ;;  %v4071_v20 = vld [vmem:[%s5686_s5 + $0x1a0] ss:$92 sps:$4 sm:$0xff]  }
 0x24a   :  { %2850 = vmatprep.subr.bf16.mxu1 %v3992_v21  ;;  %v4074_v21 = vld [vmem:[%s5686_s5 + $0x1a8] ss:$92 sps:$4 sm:$0xff]  }
 0x24c   :  { %2810 = vmatpush1.bf16.msra.mxu0 %v3987_v22  ;;  %v4079_v22 = vld [vmem:[%s5686_s5 + $0x25c] ss:$92 sps:$4 sm:$0xff]  }
 0x24d   :  { %2851 = vmatpush1.bf16.msra.mxu1 %v3990_v23  ;;  %2811 = vmatprep.subr.bf16.mxu0 %v3995_v24  ;;  %v4082_v23 = vld [vmem:[%s5686_s5 + $0x264] ss:$92 sps:$4 sm:$0xff]   ;;  %v4077_v24 = vld [vmem:[%s5686_s5 + $0x258] ss:$92 sps:$4 sm:$0xff]  }
 0x24e   :  { %2852 = vmatprep.subr.bf16.mxu1 %v3998_v25  ;;  %v4080_v25 = vld [vmem:[%s5686_s5 + $0x260] ss:$92 sps:$4 sm:$0xff]  }
 0x250   :  { %2812 = vmatpush1.bf16.msra.mxu0 %v3993_v26  ;;  %v4085_v26 = vld [vmem:[%s5686_s5 + $0x314] ss:$92 sps:$4 sm:$0xff]  }
 0x251   :  { %2853 = vmatpush1.bf16.msra.mxu1 %v3996_v27  ;;  %2813 = vmatprep.subr.bf16.mxu0 %v4001_v28  ;;  %v4088_v27 = vld [vmem:[%s5686_s5 + $0x31c] ss:$92 sps:$4 sm:$0xff]   ;;  %v4083_v28 = vld [vmem:[%s5686_s5 + $0x310] ss:$92 sps:$4 sm:$0xff]  }
 0x252   :  { %2854 = vmatprep.subr.bf16.mxu1 %v4004_v29  ;;  %v4086_v29 = vld [vmem:[%s5686_s5 + $0x318] ss:$92 sps:$4 sm:$0xff]  }
 0x254   :  { %2814 = vmatpush1.bf16.msra.mxu0 %v3999_v30  ;;  %v4091_v30 = vld [vmem:[%s5686_s5 + $0x3cc] ss:$92 sps:$4 sm:$0xff]  }
 0x255   :  { %2855 = vmatpush1.bf16.msra.mxu1 %v4002_v31  ;;  %2815 = vmatprep.subr.bf16.mxu0 %v4007_v32  ;;  %v4094_v31 = vld [vmem:[%s5686_s5 + $0x3d4] ss:$92 sps:$4 sm:$0xff]   ;;  %v4089_v32 = vld [vmem:[%s5686_s5 + $0x3c8] ss:$92 sps:$4 sm:$0xff]  }
 0x256   :  { %2856 = vmatprep.subr.bf16.mxu1 %v4010_v33  ;;  %v4092_v33 = vld [vmem:[%s5686_s5 + $0x3d0] ss:$92 sps:$4 sm:$0xff]  }
 0x258   :  { %2816 = vmatpush1.bf16.msra.mxu0 %v4005_v34  ;;  %v4097_v34 = vld [vmem:[%s5686_s5 + $0x484] ss:$92 sps:$4 sm:$0xff]  }
 0x259   :  { %2857 = vmatpush1.bf16.msra.mxu1 %v4008_v35  ;;  %2817 = vmatprep.subr.bf16.mxu0 %v4013_v36  ;;  %v4100_v35 = vld [vmem:[%s5686_s5 + $0x48c] ss:$92 sps:$4 sm:$0xff]   ;;  %v4095_v36 = vld [vmem:[%s5686_s5 + $0x480] ss:$92 sps:$4 sm:$0xff]  }
 0x25a   :  { %2858 = vmatprep.subr.bf16.mxu1 %v4016_v37  ;;  %v4098_v37 = vld [vmem:[%s5686_s5 + $0x488] ss:$92 sps:$4 sm:$0xff]  }
 0x25c   :  { %2818 = vmatpush1.bf16.msra.mxu0 %v4011_v38  ;;  %v4103_v38 = vld [vmem:[%s5686_s5 + $0x53c] ss:$92 sps:$4 sm:$0xff]  }
 0x25d   :  { %2859 = vmatpush1.bf16.msra.mxu1 %v4014_v42  ;;  %2819 = vmatprep.subr.bf16.mxu0 %v4019_v44  ;;  %v4106_v42 = vld [vmem:[%s5686_s5 + $0x544] ss:$92 sps:$4 sm:$0xff]   ;;  %v4101_v44 = vld [vmem:[%s5686_s5 + $0x538] ss:$92 sps:$4 sm:$0xff]  }
 0x25e   :  { %2860 = vmatprep.subr.bf16.mxu1 %v4022_v45  ;;  %v4104_v45 = vld [vmem:[%s5686_s5 + $0x540] ss:$92 sps:$4 sm:$0xff]  }
 0x260   :  { %2820 = vmatpush1.bf16.msra.mxu0 %v4017_v46  ;;  %v4109_v46 = vld [vmem:[%s5686_s5 + $0x5f4] ss:$92 sps:$4 sm:$0xff]  }
 0x261   :  { %2861 = vmatpush1.bf16.msra.mxu1 %v4020_v47  ;;  %2821 = vmatprep.subr.bf16.mxu0 %v4025_v48  ;;  %v4112_v47 = vld [vmem:[%s5686_s5 + $0x5fc] ss:$92 sps:$4 sm:$0xff]   ;;  %v4107_v48 = vld [vmem:[%s5686_s5 + $0x5f0] ss:$92 sps:$4 sm:$0xff]  }
 0x262   :  { %2862 = vmatprep.subr.bf16.mxu1 %v4028_v49  ;;  %v4110_v49 = vld [vmem:[%s5686_s5 + $0x5f8] ss:$92 sps:$4 sm:$0xff]  }
 0x264   :  { %2822 = vmatpush1.bf16.msra.mxu0 %v4023_v50  ;;  %v4115_v50 = vld [vmem:[%s5686_s5 + $0x6ac] ss:$92 sps:$4 sm:$0xff]  }
 0x265   :  { %2863 = vmatpush1.bf16.msra.mxu1 %v4026_v51  ;;  %2823 = vmatprep.subr.bf16.mxu0 %v4031_v52  ;;  %v4118_v51 = vld [vmem:[%s5686_s5 + $0x6b4] ss:$92 sps:$4 sm:$0xff]   ;;  %v4113_v52 = vld [vmem:[%s5686_s5 + $0x6a8] ss:$92 sps:$4 sm:$0xff]  }
 0x266   :  { %2864 = vmatprep.subr.bf16.mxu1 %v4034_v53  ;;  %v4116_v53 = vld [vmem:[%s5686_s5 + $0x6b0] ss:$92 sps:$4 sm:$0xff]  }
 0x268   :  { %2824 = vmatpush1.bf16.msra.mxu0 %v4029_v54  ;;  %v4121_v54 = vld [vmem:[%s5686_s5 + $0x764] ss:$92 sps:$4 sm:$0xff]  }
 0x269   :  { %2865 = vmatpush1.bf16.msra.mxu1 %v4032_v55  ;;  %2825 = vmatprep.subr.bf16.mxu0 %v4037_v56  ;;  %v4124_v55 = vld [vmem:[%s5686_s5 + $0x76c] ss:$92 sps:$4 sm:$0xff]   ;;  %v4119_v56 = vld [vmem:[%s5686_s5 + $0x760] ss:$92 sps:$4 sm:$0xff]  }
 0x26a   :  { %2866 = vmatprep.subr.bf16.mxu1 %v4040_v57  ;;  %v4122_v57 = vld [vmem:[%s5686_s5 + $0x768] ss:$92 sps:$4 sm:$0xff]  }
 0x26c   :  { %2826 = vmatpush1.bf16.msra.mxu0 %v4035_v58  ;;  %v4127_v58 = vld [vmem:[%s5686_s5 + $0x81c] ss:$92 sps:$4 sm:$0xff]  }
 0x26d   :  { %2867 = vmatpush1.bf16.msra.mxu1 %v4038_v59  ;;  %2827 = vmatprep.subr.bf16.mxu0 %v4043_v60  ;;  %v4130_v59 = vld [vmem:[%s5686_s5 + $0x824] ss:$92 sps:$4 sm:$0xff]   ;;  %v4125_v60 = vld [vmem:[%s5686_s5 + $0x818] ss:$92 sps:$4 sm:$0xff]  }
 0x26e   :  { %2868 = vmatprep.subr.bf16.mxu1 %v4046_v61  ;;  %v4128_v61 = vld [vmem:[%s5686_s5 + $0x820] ss:$92 sps:$4 sm:$0xff]  }
 0x270   :  { %2828 = vmatpush1.bf16.msra.mxu0 %v4041_v63  ;;  %v4133_v63 = vld [vmem:[%s5686_s5 + $0x8d4] ss:$92 sps:$4 sm:$0xff]  }
 0x271   :  { %2869 = vmatpush1.bf16.msra.mxu1 %v4044_v0  ;;  %2829 = vmatprep.subr.bf16.mxu0 %v4049_v2  ;;  %v4136_v0 = vld [vmem:[%s5686_s5 + $0x8dc] ss:$92 sps:$4 sm:$0xff]   ;;  %v4131_v2 = vld [vmem:[%s5686_s5 + $0x8d0] ss:$92 sps:$4 sm:$0xff]  }
 0x272   :  { %2870 = vmatprep.subr.bf16.mxu1 %v4052_v3  ;;  %v4134_v3 = vld [vmem:[%s5686_s5 + $0x8d8] ss:$92 sps:$4 sm:$0xff]  }
 0x274   :  { %2830 = vmatpush1.bf16.msra.mxu0 %v4047_v4  ;;  %v4139_v4 = vld [vmem:[%s5686_s5 + $0x98c] ss:$92 sps:$4 sm:$0xff]  }
 0x275   :  { %2871 = vmatpush1.bf16.msra.mxu1 %v4050_v5  ;;  %2831 = vmatprep.subr.bf16.mxu0 %v4055_v6  ;;  %v4142_v5 = vld [vmem:[%s5686_s5 + $0x994] ss:$92 sps:$4 sm:$0xff]   ;;  %v4137_v6 = vld [vmem:[%s5686_s5 + $0x988] ss:$92 sps:$4 sm:$0xff]  }
 0x276   :  { %2872 = vmatprep.subr.bf16.mxu1 %v4058_v7  ;;  %v4140_v7 = vld [vmem:[%s5686_s5 + $0x990] ss:$92 sps:$4 sm:$0xff]  }
 0x278   :  { %2832 = vmatpush1.bf16.msra.mxu0 %v4053_v8  ;;  %v4145_v8 = vld [vmem:[%s5686_s5 + $0xa44] ss:$92 sps:$4 sm:$0xff]  }
 0x279   :  { %2873 = vmatpush1.bf16.msra.mxu1 %v4056_v9  ;;  %2883 = vmatprep.subr.bf16.mxu0 %v4061_v10  ;;  %v4148_v9 = vld [vmem:[%s5686_s5 + $0xa4c] ss:$92 sps:$4 sm:$0xff]   ;;  %v4143_v10 = vld [vmem:[%s5686_s5 + $0xa40] ss:$92 sps:$4 sm:$0xff]  }
 0x27a   :  { %2924 = vmatprep.subr.bf16.mxu1 %v4064_v11  ;;  %v4146_v11 = vld [vmem:[%s5686_s5 + $0xa48] ss:$92 sps:$4 sm:$0xff]  }
 0x27b   :  { %2834 = vmatmul.mubr.bf16.vlgmr.msra.gmra.mrb[12].mxu0 %v4657_v1 }
 0x27c   :  { %2875 = vmatmul.mubr.bf16.vlgmr.msra.gmra.mrb[12].mxu1 %v4657_v1  ;;  %2884 = vmatpush1.bf16.msra.mxu0 %v4059_v12  ;;  %v4151_v12 = vld [vmem:[%s5686_s5 + $0xafc] ss:$92 sps:$4 sm:$0xff]  }
 0x27d   :  { %2915 = vmatprep.mubr.bf16.mxu0 %v4649_v62  ;;  %2925 = vmatpush1.bf16.msra.mxu1 %v4062_v13  ;;  %v4154_v13 = vld [vmem:[%s5686_s5 + $0xb04] ss:$92 sps:$4 sm:$0xff]  }
 0x27e   :  { %2956 = vmatprep.mubr.bf16.mxu1 %v4649_v62  ;;  %2885 = vmatprep.subr.bf16.mxu0 %v4067_v14  ;;  %v4149_v14 = vld [vmem:[%s5686_s5 + $0xaf8] ss:$92 sps:$4 sm:$0xff]  }
 0x27f   :  { %2926 = vmatprep.subr.bf16.mxu1 %v4070_v15  ;;  %v4152_v15 = vld [vmem:[%s5686_s5 + $0xb00] ss:$92 sps:$4 sm:$0xff]  }
 0x280   :  { %2886 = vmatpush1.bf16.msra.mxu0 %v4065_v16  ;;  %v4157_v16 = vld [vmem:[%s5686_s5 + $0x44] ss:$92 sps:$4 sm:$0xff]  }
 0x281   :  { %2927 = vmatpush1.bf16.msra.mxu1 %v4068_v17  ;;  %2887 = vmatprep.subr.bf16.mxu0 %v4073_v18  ;;  %v4160_v17 = vld [vmem:[%s5686_s5 + $0x4c] ss:$92 sps:$4 sm:$0xff]   ;;  %v4155_v18 = vld [vmem:[%s5686_s5 + $0x40] ss:$92 sps:$4 sm:$0xff]  }
 0x282   :  { %2928 = vmatprep.subr.bf16.mxu1 %v4076_v19  ;;  %v4158_v19 = vld [vmem:[%s5686_s5 + $0x48] ss:$92 sps:$4 sm:$0xff]  }
 0x284   :  { %2888 = vmatpush1.bf16.msra.mxu0 %v4071_v20  ;;  %v4163_v20 = vld [vmem:[%s5686_s5 + $0xfc] ss:$92 sps:$4 sm:$0xff]  }
 0x285   :  { %2929 = vmatpush1.bf16.msra.mxu1 %v4074_v21  ;;  %2889 = vmatprep.subr.bf16.mxu0 %v4079_v22  ;;  %v4166_v21 = vld [vmem:[%s5686_s5 + $0x104] ss:$92 sps:$4 sm:$0xff]   ;;  %v4161_v22 = vld [vmem:[%s5686_s5 + $0xf8] ss:$92 sps:$4 sm:$0xff]  }
 0x286   :  { %2930 = vmatprep.subr.bf16.mxu1 %v4082_v23  ;;  %v4164_v23 = vld [vmem:[%s5686_s5 + $0x100] ss:$92 sps:$4 sm:$0xff]  }
 0x288   :  { %2890 = vmatpush1.bf16.msra.mxu0 %v4077_v24  ;;  %v4169_v24 = vld [vmem:[%s5686_s5 + $0x1b4] ss:$92 sps:$4 sm:$0xff]  }
 0x289   :  { %2931 = vmatpush1.bf16.msra.mxu1 %v4080_v25  ;;  %2891 = vmatprep.subr.bf16.mxu0 %v4085_v26  ;;  %v4172_v25 = vld [vmem:[%s5686_s5 + $0x1bc] ss:$92 sps:$4 sm:$0xff]   ;;  %v4167_v26 = vld [vmem:[%s5686_s5 + $0x1b0] ss:$92 sps:$4 sm:$0xff]  }
 0x28a   :  { %2932 = vmatprep.subr.bf16.mxu1 %v4088_v27  ;;  %v4170_v27 = vld [vmem:[%s5686_s5 + $0x1b8] ss:$92 sps:$4 sm:$0xff]  }
 0x28c   :  { %2892 = vmatpush1.bf16.msra.mxu0 %v4083_v28  ;;  %v4175_v28 = vld [vmem:[%s5686_s5 + $0x26c] ss:$92 sps:$4 sm:$0xff]  }
 0x28d   :  { %2933 = vmatpush1.bf16.msra.mxu1 %v4086_v29  ;;  %2893 = vmatprep.subr.bf16.mxu0 %v4091_v30  ;;  %v4178_v29 = vld [vmem:[%s5686_s5 + $0x274] ss:$92 sps:$4 sm:$0xff]   ;;  %v4173_v30 = vld [vmem:[%s5686_s5 + $0x268] ss:$92 sps:$4 sm:$0xff]  }
 0x28e   :  { %2934 = vmatprep.subr.bf16.mxu1 %v4094_v31  ;;  %v4176_v31 = vld [vmem:[%s5686_s5 + $0x270] ss:$92 sps:$4 sm:$0xff]  }
 0x290   :  { %2894 = vmatpush1.bf16.msra.mxu0 %v4089_v32  ;;  %v4181_v32 = vld [vmem:[%s5686_s5 + $0x324] ss:$92 sps:$4 sm:$0xff]  }
 0x291   :  { %2935 = vmatpush1.bf16.msra.mxu1 %v4092_v33  ;;  %2895 = vmatprep.subr.bf16.mxu0 %v4097_v34  ;;  %v4184_v33 = vld [vmem:[%s5686_s5 + $0x32c] ss:$92 sps:$4 sm:$0xff]   ;;  %v5296_v34 = vsub.s32 2, %v4636_v40 }
 0x292   :  { %2936 = vmatprep.subr.bf16.mxu1 %v4100_v35  ;;  %v4179_v35 = vld [vmem:[%s5686_s5 + $0x320] ss:$92 sps:$4 sm:$0xff]  }
 0x294   :  { %2896 = vmatpush1.bf16.msra.mxu0 %v4095_v36  ;;  %v5304_v36 = vld [vmem:[%s5689_s6] sm:$0xff] }
 0x295   :  { %2937 = vmatpush1.bf16.msra.mxu1 %v4098_v37  ;;  %2897 = vmatprep.subr.bf16.mxu0 %v4103_v38  ;;  %v4330_v37 = vmov 1966171168  }
 0x296   :  { %2938 = vmatprep.subr.bf16.mxu1 %v4106_v42  ;;  %v3156_v38 = vunpack.c.l.s4 %v4330_v37  ;;  %v5307_v42 = vsub.s32 3, %v4636_v40  ;;  %v4232_v37 = vld [vmem:[%s5686_s5 + $0x8ec] ss:$92 sps:$4 sm:$0xff]  }
 0x298   :  { %2898 = vmatpush1.bf16.msra.mxu0 %v4101_v44  ;;  %v4182_v44 = vld [vmem:[%s5686_s5 + $0x328] ss:$92 sps:$4 sm:$0xff]  }
 0x299   :  { %2939 = vmatpush1.bf16.msra.mxu1 %v4104_v45  ;;  %2899 = vmatprep.subr.bf16.mxu0 %v4109_v46  ;;  %v4187_v45 = vld [vmem:[%s5686_s5 + $0x3dc] ss:$92 sps:$4 sm:$0xff]   ;;  %v4190_v46 = vld [vmem:[%s5686_s5 + $0x3e4] ss:$92 sps:$4 sm:$0xff]  }
 0x29a   :  { %2940 = vmatprep.subr.bf16.mxu1 %v4112_v47  ;;  %v2525_v47 = vrot.slane %v5304_v36, %v4639_v41 }
 0x29c   :  { %2900 = vmatpush1.bf16.msra.mxu0 %v4107_v48  ;;  %v2533_v48 = vrot.slane %v5304_v36, %v5296_v34 }
 0x29d   :  { %2941 = vmatpush1.bf16.msra.mxu1 %v4110_v49  ;;  %2901 = vmatprep.subr.bf16.mxu0 %v4115_v50  ;;  %v4185_v49 = vld [vmem:[%s5686_s5 + $0x3d8] ss:$92 sps:$4 sm:$0xff]   ;;  %v2529_v50 = vrot.slane %v5304_v36, %v4645_v43 }
 0x29e   :  { %2942 = vmatprep.subr.bf16.mxu1 %v4118_v51  ;;  %v3157_v51 = vunpack.c.0.s8 %v3156_v38  ;;  %v4227_v38 = vld [vmem:[%s5686_s5 + $0x8e0] ss:$92 sps:$4 sm:$0xff]  }
 0x2a0   :  { %2902 = vmatpush1.bf16.msra.mxu0 %v4113_v52  ;;  %v2537_v52 = vrot.slane %v5304_v36, %v5307_v42 }
 0x2a1   :  { %2943 = vmatpush1.bf16.msra.mxu1 %v4116_v53  ;;  %2903 = vmatprep.subr.bf16.mxu0 %v4121_v54  ;;  %v4188_v53 = vld [vmem:[%s5686_s5 + $0x3e0] ss:$92 sps:$4 sm:$0xff]   ;;  %v4193_v54 = vld [vmem:[%s5686_s5 + $0x494] ss:$92 sps:$4 sm:$0xff]  }
 0x2a2   :  { %2944 = vmatprep.subr.bf16.mxu1 %v4124_v55 }
 0x2a4   :  { %2904 = vmatpush1.bf16.msra.mxu0 %v4119_v56 }
 0x2a5   :  { %2945 = vmatpush1.bf16.msra.mxu1 %v4122_v57  ;;  %2905 = vmatprep.subr.bf16.mxu0 %v4127_v58  ;;  %v4196_v57 = vld [vmem:[%s5686_s5 + $0x49c] ss:$92 sps:$4 sm:$0xff]  }
 0x2a6   :  { %2946 = vmatprep.subr.bf16.mxu1 %v4130_v59 }
 0x2a8   :  { %2906 = vmatpush1.bf16.msra.mxu0 %v4125_v60 }
 0x2a9   :  { %2947 = vmatpush1.bf16.msra.mxu1 %v4128_v61  ;;  %2907 = vmatprep.subr.bf16.mxu0 %v4133_v63 }
 0x2aa   :  { %2948 = vmatprep.subr.bf16.mxu1 %v4136_v0  ;;  %v5339_v0 = vsub.s32 %v3157_v51, %v4636_v40  ;;  %v4239_v51 = vld [vmem:[%s5686_s5 + $0xa50] ss:$92 sps:$4 sm:$0xff]  }
 0x2ac   :  { %2908 = vmatpush1.bf16.msra.mxu0 %v4131_v2 }
 0x2ad   :  { %2949 = vmatpush1.bf16.msra.mxu1 %v4134_v3  ;;  %2909 = vmatprep.subr.bf16.mxu0 %v4139_v4 }
 0x2ae   :  { %2950 = vmatprep.subr.bf16.mxu1 %v4142_v5  ;;  %v4191_v5 = vld [vmem:[%s5686_s5 + $0x490] ss:$92 sps:$4 sm:$0xff]  }
 0x2b0   :  { %2910 = vmatpush1.bf16.msra.mxu0 %v4137_v6 }
 0x2b1   :  { %2951 = vmatpush1.bf16.msra.mxu1 %v4140_v7  ;;  %2911 = vmatprep.subr.bf16.mxu0 %v4145_v8  ;;  %v4194_v8 = vld [vmem:[%s5686_s5 + $0x498] ss:$92 sps:$4 sm:$0xff]  }
 0x2b2   :  { %2952 = vmatprep.subr.bf16.mxu1 %v4148_v9  ;;  %v4199_v9 = vld [vmem:[%s5686_s5 + $0x54c] ss:$92 sps:$4 sm:$0xff]  }
 0x2b4   :  { %2912 = vmatpush1.bf16.msra.mxu0 %v4143_v10 }
 0x2b5   :  { %2953 = vmatpush1.bf16.msra.mxu1 %v4146_v11  ;;  %2913 = vmatprep.subr.bf16.mxu0 %v4151_v12  ;;  %v4202_v12 = vld [vmem:[%s5686_s5 + $0x554] ss:$92 sps:$4 sm:$0xff]  }
 0x2b6   :  { %2954 = vmatprep.subr.bf16.mxu1 %v4154_v13 }
 0x2b8   :  { %2914 = vmatpush1.bf16.msra.mxu0 %v4149_v14 }
 0x2b9   :  { %2955 = vmatpush1.bf16.msra.mxu1 %v4152_v15  ;;  %2965 = vmatprep.subr.bf16.mxu0 %v4157_v16  ;;  %v4197_v15 = vld [vmem:[%s5686_s5 + $0x548] ss:$92 sps:$4 sm:$0xff]   ;;  %v4200_v16 = vld [vmem:[%s5686_s5 + $0x550] ss:$92 sps:$4 sm:$0xff]  }
 0x2ba   :  { %3006 = vmatprep.subr.bf16.mxu1 %v4160_v17  ;;  %v4205_v17 = vld [vmem:[%s5686_s5 + $0x604] ss:$92 sps:$4 sm:$0xff]  }
 0x2bb   :  { %2916 = vmatmul.mubr.bf16.vlgmr.msra.gmra.mrb[16].mxu0 %v4657_v1 }
 0x2bc   :  { %2957 = vmatmul.mubr.bf16.vlgmr.msra.gmra.mrb[16].mxu1 %v4657_v1  ;;  %2966 = vmatpush1.bf16.msra.mxu0 %v4155_v18 }
 0x2bd   :  { %2997 = vmatprep.mubr.bf16.mxu0 %v4649_v62  ;;  %3007 = vmatpush1.bf16.msra.mxu1 %v4158_v19  ;;  %v4208_v19 = vld [vmem:[%s5686_s5 + $0x60c] ss:$92 sps:$4 sm:$0xff]  }
 0x2be   :  { %3038 = vmatprep.mubr.bf16.mxu1 %v4649_v62  ;;  %2967 = vmatprep.subr.bf16.mxu0 %v4163_v20  ;;  %v4203_v20 = vld [vmem:[%s5686_s5 + $0x600] ss:$92 sps:$4 sm:$0xff]  }
 0x2bf   :  { %3008 = vmatprep.subr.bf16.mxu1 %v4166_v21  ;;  %v4206_v21 = vld [vmem:[%s5686_s5 + $0x608] ss:$92 sps:$4 sm:$0xff]  }
 0x2c0   :  { %2968 = vmatpush1.bf16.msra.mxu0 %v4161_v22  ;;  %v4211_v22 = vld [vmem:[%s5686_s5 + $0x6bc] ss:$92 sps:$4 sm:$0xff]  }
 0x2c1   :  { %3009 = vmatpush1.bf16.msra.mxu1 %v4164_v23  ;;  %2969 = vmatprep.subr.bf16.mxu0 %v4169_v24  ;;  %v4214_v23 = vld [vmem:[%s5686_s5 + $0x6c4] ss:$92 sps:$4 sm:$0xff]   ;;  %v4209_v24 = vld [vmem:[%s5686_s5 + $0x6b8] ss:$92 sps:$4 sm:$0xff]  }
 0x2c2   :  { %3010 = vmatprep.subr.bf16.mxu1 %v4172_v25  ;;  %v4212_v25 = vld [vmem:[%s5686_s5 + $0x6c0] ss:$92 sps:$4 sm:$0xff]  }
 0x2c4   :  { %2970 = vmatpush1.bf16.msra.mxu0 %v4167_v26  ;;  %v4217_v26 = vld [vmem:[%s5686_s5 + $0x774] ss:$92 sps:$4 sm:$0xff]  }
 0x2c5   :  { %3011 = vmatpush1.bf16.msra.mxu1 %v4170_v27  ;;  %2971 = vmatprep.subr.bf16.mxu0 %v4175_v28  ;;  %v4220_v27 = vld [vmem:[%s5686_s5 + $0x77c] ss:$92 sps:$4 sm:$0xff]   ;;  %v4215_v28 = vld [vmem:[%s5686_s5 + $0x770] ss:$92 sps:$4 sm:$0xff]  }
 0x2c6   :  { %3012 = vmatprep.subr.bf16.mxu1 %v4178_v29  ;;  %v4218_v29 = vld [vmem:[%s5686_s5 + $0x778] ss:$92 sps:$4 sm:$0xff]  }
 0x2c8   :  { %2972 = vmatpush1.bf16.msra.mxu0 %v4173_v30  ;;  %v4223_v30 = vld [vmem:[%s5686_s5 + $0x82c] ss:$92 sps:$4 sm:$0xff]  }
 0x2c9   :  { %3013 = vmatpush1.bf16.msra.mxu1 %v4176_v31  ;;  %2973 = vmatprep.subr.bf16.mxu0 %v4181_v32  ;;  %v4226_v31 = vld [vmem:[%s5686_s5 + $0x834] ss:$92 sps:$4 sm:$0xff]   ;;  %v4221_v32 = vld [vmem:[%s5686_s5 + $0x828] ss:$92 sps:$4 sm:$0xff]  }
 0x2ca   :  { %3014 = vmatprep.subr.bf16.mxu1 %v4184_v33  ;;  %v4224_v33 = vld [vmem:[%s5686_s5 + $0x830] ss:$92 sps:$4 sm:$0xff]  }
 0x2cc   :  { %2974 = vmatpush1.bf16.msra.mxu0 %v4179_v35  ;;  %v4229_v35 = vld [vmem:[%s5686_s5 + $0x8e4] ss:$92 sps:$4 sm:$0xff]  }
 0x2cd   :  { %3015 = vmatpush1.bf16.msra.mxu1 %v4182_v44  ;;  %2975 = vmatprep.subr.bf16.mxu0 %v4187_v45  ;;  %v4230_v44 = vld [vmem:[%s5686_s5 + $0x8e8] ss:$92 sps:$4 sm:$0xff]   ;;  %v4235_v45 = vld [vmem:[%s5686_s5 + $0x99c] ss:$92 sps:$4 sm:$0xff]  }
 0x2ce   :  { %v2671_v55 = vpop.f32.mrb[4].mxu0  ;;  %v2712_v56 = vpop.f32.mrb[4].mxu1  ;;  %3016 = vmatprep.subr.bf16.mxu1 %v4190_v46  ;;  %v4238_v46 = vld [vmem:[%s5686_s5 + $0x9a4] ss:$92 sps:$4 sm:$0xff]  }
 0x2cf   :  { %v2672_v58 = vadd.f32 %v2671_v55, %v2525_v47  ;;  %v2713_v59 = vadd.f32 %v2712_v56, %v2533_v48  ;;  %v2673_v60 = vpop.f32.mrb[5].mxu0  ;;  %v2714_v61 = vpop.f32.mrb[5].mxu1  ;;  %v4233_v47 = vld [vmem:[%s5686_s5 + $0x998] ss:$92 sps:$4 sm:$0xff]   ;;  %v4236_v48 = vld [vmem:[%s5686_s5 + $0x9a0] ss:$92 sps:$4 sm:$0xff]  }
 0x2d0   :  { %v2674_v63 = vadd.f32 %v2673_v60, %v2529_v50  ;;  %v2715_v2 = vadd.f32 %v2714_v61, %v2537_v52  ;;  %2976 = vmatpush1.bf16.msra.mxu0 %v4185_v49  ;;  %v2675_v3 = vpop.f32.mrb[6].mxu0  ;;  %v2716_v4 = vpop.f32.mrb[6].mxu1  ;;  %v4241_v49 = vld [vmem:[%s5686_s5 + $0xa54] ss:$92 sps:$4 sm:$0xff]   ;;  %v4244_v50 = vld [vmem:[%s5686_s5 + $0xa5c] ss:$92 sps:$4 sm:$0xff]  }
 0x2d1   :  { %3017 = vmatpush1.bf16.msra.mxu1 %v4188_v53  ;;  %v2676_v6 = vpop.f32.mrb[7].mxu0  ;;  %v2717_v7 = vpop.f32.mrb[7].mxu1  ;;  %2977 = vmatprep.subr.bf16.mxu0 %v4193_v54  ;;  %v4242_v52 = vld [vmem:[%s5686_s5 + $0xa58] ss:$92 sps:$4 sm:$0xff]   ;;  %v4247_v53 = vld [vmem:[%s5686_s5 + $0xb0c] ss:$92 sps:$4 sm:$0xff]  }
 0x2d2   :  { %v3151_v10 = vcombine.low %v2672_v58, %v2674_v63  ;;  %v3152_v11 = vcombine.low %v2713_v59, %v2715_v2  ;;  %3018 = vmatprep.subr.bf16.mxu1 %v4196_v57  ;;  %v4250_v54 = vld [vmem:[%s5686_s5 + $0xb14] ss:$92 sps:$4 sm:$0xff]   ;;  %v4245_v55 = vld [vmem:[%s5686_s5 + $0xb08] ss:$92 sps:$4 sm:$0xff]   ;;  %v4261_v6 = vld [vmem:[%s5686_s5 + $0x1c0] ss:$92 sps:$4 sm:$0xff]  }
 0x2d3   :  { %v4248_v56 = vld [vmem:[%s5686_s5 + $0xb10] ss:$92 sps:$4 sm:$0xff]   ;;  %v4254_v58 = vld [vmem:[%s5686_s5 + $0x618] ss:$92 sps:$4 sm:$0xff]   ;;  %v4256_v2 = vld [vmem:[%s5686_s5 + $0x108] ss:$92 sps:$4 sm:$0xff]  }
 0x2d4   :  { %v5354_v13 = vrot.slane %v3151_v10, %v5339_v0  ;;  %v5357_v14 = vrot.slane %v3152_v11, %v5339_v0  ;;  %2978 = vmatpush1.bf16.msra.mxu0 %v4191_v5  ;;  %v4253_v57 = vld [vmem:[%s5686_s5 + $0x54] ss:$92 sps:$4 sm:$0xff]   ;;  %v4258_v61 = vld [vmem:[%s5686_s5 + $0x10c] ss:$92 sps:$4 sm:$0xff]   ;;  %v4263_v4 = vld [vmem:[%s5686_s5 + $0x1c4] ss:$92 sps:$4 sm:$0xff]  }
 0x2d5   :  { %3019 = vmatpush1.bf16.msra.mxu1 %v4194_v8  ;;  %2979 = vmatprep.subr.bf16.mxu0 %v4199_v9  ;;  %v4251_v59 = vld [vmem:[%s5686_s5 + $0x50] ss:$92 sps:$4 sm:$0xff]   ;;  %v4255_v60 = vld [vmem:[%s5686_s5 + $0x58] ss:$92 sps:$4 sm:$0xff]   ;;  %v4264_v5 = vld [vmem:[%s5686_s5 + $0x788] ss:$92 sps:$4 sm:$0xff]  }
 0x2d6   :  { %v3183_v18 = vcombine.low %v5354_v13, %v5357_v14  ;;  %3020 = vmatprep.subr.bf16.mxu1 %v4202_v12  ;;  %v4259_v63 = vld [vmem:[%s5686_s5 + $0x6d0] ss:$92 sps:$4 sm:$0xff]   ;;  %v4265_v7 = vld [vmem:[%s5686_s5 + $0x1c8] ss:$92 sps:$4 sm:$0xff]   ;;  %v4269_v8 = vld [vmem:[%s5686_s5 + $0x840] ss:$92 sps:$4 sm:$0xff]  }
 0x2d7   :  { %v4260_v3 = vld [vmem:[%s5686_s5 + $0x110] ss:$92 sps:$4 sm:$0xff]   ;;  %v4266_v9 = vld [vmem:[%s5686_s5 + $0x278] ss:$92 sps:$4 sm:$0xff]   ;;  %v4270_v10 = vld [vmem:[%s5686_s5 + $0x280] ss:$92 sps:$4 sm:$0xff]  }
 0x2d8   :  { %2980 = vmatpush1.bf16.msra.mxu0 %v4197_v15  ;;  %v4273_v11 = vld [vmem:[%s5686_s5 + $0x334] ss:$92 sps:$4 sm:$0xff]   ;;  %v5522_v15 = vsub.s32 4, %v4636_v40  ;;  %v4294_v13 = vld [vmem:[%s5686_s5 + $0x6c8] ss:$92 sps:$4 sm:$0xff]  }
 0x2d9   :  { %3021 = vmatpush1.bf16.msra.mxu1 %v4200_v16  ;;  %2981 = vmatprep.subr.bf16.mxu0 %v4205_v17  ;;  %v4274_v12 = vld [vmem:[%s5686_s5 + $0x8f8] ss:$92 sps:$4 sm:$0xff]   ;;  %v5525_v16 = vsub.s32 6, %v4636_v40  ;;  %v4271_v17 = vld [vmem:[%s5686_s5 + $0x330] ss:$92 sps:$4 sm:$0xff]  }
 0x2da   :  { %3022 = vmatprep.subr.bf16.mxu1 %v4208_v19  ;;  %v5531_v19 = vsub.s32 5, %v4636_v40  ;;  %v4299_v14 = vld [vmem:[%s5686_s5 + $0x784] ss:$92 sps:$4 sm:$0xff]  }
 0x2dc   :  { %2982 = vmatpush1.bf16.msra.mxu0 %v4203_v20  ;;  %v2552_v20 = vsub.s32 7, %v4636_v40 }
 0x2dd   :  { %3023 = vmatpush1.bf16.msra.mxu1 %v4206_v21  ;;  %2983 = vmatprep.subr.bf16.mxu0 %v4211_v22  ;;  %v4275_v21 = vld [vmem:[%s5686_s5 + $0x338] ss:$92 sps:$4 sm:$0xff]   ;;  %v4278_v22 = vld [vmem:[%s5686_s5 + $0x3ec] ss:$92 sps:$4 sm:$0xff]  }
 0x2de   :  { %3024 = vmatprep.subr.bf16.mxu1 %v4214_v23  ;;  %v4279_v23 = vld [vmem:[%s5686_s5 + $0x9b0] ss:$92 sps:$4 sm:$0xff]  }
 0x2e0   :  { %2984 = vmatpush1.bf16.msra.mxu0 %v4209_v24  ;;  %v2541_v24 = vrot.slane %v5304_v36, %v5522_v15 }
 0x2e1   :  { %3025 = vmatpush1.bf16.msra.mxu1 %v4212_v25  ;;  %2985 = vmatprep.subr.bf16.mxu0 %v4217_v26  ;;  %v2549_v25 = vrot.slane %v5304_v36, %v5525_v16  ;;  %v2545_v26 = vrot.slane %v5304_v36, %v5531_v19 }
 0x2e2   :  { %3026 = vmatprep.subr.bf16.mxu1 %v4220_v27  ;;  %v2553_v27 = vrot.slane %v5304_v36, %v2552_v20  ;;  %v4284_v36 = vld [vmem:[%s5686_s5 + $0xa68] ss:$92 sps:$4 sm:$0xff]  }
 0x2e4   :  { %2986 = vmatpush1.bf16.msra.mxu0 %v4215_v28  ;;  %v4276_v28 = vld [vmem:[%s5686_s5 + $0x3e8] ss:$92 sps:$4 sm:$0xff]  }
 0x2e5   :  { %3027 = vmatpush1.bf16.msra.mxu1 %v4218_v29  ;;  %2987 = vmatprep.subr.bf16.mxu0 %v4223_v30  ;;  %v4280_v29 = vld [vmem:[%s5686_s5 + $0x3f0] ss:$92 sps:$4 sm:$0xff]   ;;  %v4283_v30 = vld [vmem:[%s5686_s5 + $0x4a4] ss:$92 sps:$4 sm:$0xff]  }
 0x2e6   :  { %3028 = vmatprep.subr.bf16.mxu1 %v4226_v31 }
 0x2e8   :  { %2988 = vmatpush1.bf16.msra.mxu0 %v4221_v32 }
 0x2e9   :  { %3029 = vmatpush1.bf16.msra.mxu1 %v4224_v33  ;;  %2989 = vmatprep.subr.bf16.mxu0 %v4229_v35 }
 0x2ea   :  { %3030 = vmatprep.subr.bf16.mxu1 %v4232_v37 }
 0x2ec   :  { %2990 = vmatpush1.bf16.msra.mxu0 %v4227_v38 }
 0x2ed   :  { %3031 = vmatpush1.bf16.msra.mxu1 %v4230_v44  ;;  %2991 = vmatprep.subr.bf16.mxu0 %v4235_v45 }
 0x2ee   :  { %3032 = vmatprep.subr.bf16.mxu1 %v4238_v46 }
 0x2f0   :  { %2992 = vmatpush1.bf16.msra.mxu0 %v4233_v47 }
 0x2f1   :  { %3033 = vmatpush1.bf16.msra.mxu1 %v4236_v48  ;;  %2993 = vmatprep.subr.bf16.mxu0 %v4241_v49  ;;  %v4281_v48 = vld [vmem:[%s5686_s5 + $0x4a0] ss:$92 sps:$4 sm:$0xff]  }
 0x2f2   :  { %3034 = vmatprep.subr.bf16.mxu1 %v4244_v50 }
 0x2f4   :  { %2994 = vmatpush1.bf16.msra.mxu0 %v4239_v51  ;;  %v4285_v51 = vld [vmem:[%s5686_s5 + $0x4a8] ss:$92 sps:$4 sm:$0xff]  }
 0x2f5   :  { %3035 = vmatpush1.bf16.msra.mxu1 %v4242_v52  ;;  %2995 = vmatprep.subr.bf16.mxu0 %v4247_v53  ;;  %v4288_v52 = vld [vmem:[%s5686_s5 + $0x55c] ss:$92 sps:$4 sm:$0xff]  }
 0x2f6   :  { %3036 = vmatprep.subr.bf16.mxu1 %v4250_v54 }
 0x2f8   :  { %2996 = vmatpush1.bf16.msra.mxu0 %v4245_v55  ;;  %v4289_v55 = vld [vmem:[%s5686_s5 + $0xb20] ss:$92 sps:$4 sm:$0xff]  }
 0x2f9   :  { %3037 = vmatpush1.bf16.msra.mxu1 %v4248_v56  ;;  %3047 = vmatprep.subr.bf16.mxu0 %v4253_v57 }
 0x2fa   :  { %3705 = vmatprep.subr.bf16.mxu1 %v4254_v58  ;;  %v4286_v58 = vld [vmem:[%s5686_s5 + $0x558] ss:$92 sps:$4 sm:$0xff]  }
 0x2fb   :  { %2998 = vmatmul.mubr.bf16.vlgmr.msra.gmra.mrb[20].mxu0 %v4657_v1 }
 0x2fc   :  { %3039 = vmatmul.mubr.bf16.vlgmr.msra.gmra.mrb[20].mxu1 %v4657_v1  ;;  %3048 = vmatpush1.bf16.msra.mxu0 %v4251_v59  ;;  %v4290_v59 = vld [vmem:[%s5686_s5 + $0x560] ss:$92 sps:$4 sm:$0xff]  }
 0x2fd   :  { %3079 = vmatprep.mubr.bf16.mxu0 %v4649_v62  ;;  %3706 = vmatpush3.bf16.msra.mxu1 %v4255_v60  ;;  %v4293_v60 = vld [vmem:[%s5686_s5 + $0x614] ss:$92 sps:$4 sm:$0xff]  }
 0x2fe   :  { %3120 = vmatprep.mubr.bf16.mxu1 %v4649_v62  ;;  %3049 = vmatprep.subr.bf16.mxu0 %v4258_v61  ;;  %v4268_v62 = vld [vmem:[%s5686_s5 + $0x27c] ss:$92 sps:$4 sm:$0xff]  }
 0x2ff   :  { %3707 = vmatprep.subr.bf16.mxu1 %v4259_v63  ;;  %v3191_v63 = vrot.slane %v3183_v18, %v5339_v0  ;;  %v4297_v18 = vld [vmem:[%s5686_s5 + $0x780] ss:$92 sps:$4 sm:$0xff]  }
 0x300   :  { %3050 = vmatpush1.bf16.msra.mxu0 %v4256_v2 }
 0x301   :  { %3708 = vmatpush3.bf16.msra.mxu1 %v4260_v3  ;;  %3051 = vmatprep.subr.bf16.mxu0 %v4263_v4  ;;  %v4291_v3 = vld [vmem:[%s5686_s5 + $0x610] ss:$92 sps:$4 sm:$0xff]  }
 0x302   :  { %3709 = vmatprep.subr.bf16.mxu1 %v4264_v5  ;;  %v4296_v4 = vld [vmem:[%s5686_s5 + $0x6cc] ss:$92 sps:$4 sm:$0xff]  }
 0x304   :  { %3052 = vmatpush1.bf16.msra.mxu0 %v4261_v6  ;;  %v4302_v6 = vld [vmem:[%s5686_s5 + $0x83c] ss:$92 sps:$4 sm:$0xff]  }
 0x305   :  { %3710 = vmatpush3.bf16.msra.mxu1 %v4265_v7  ;;  %3053 = vmatprep.subr.bf16.mxu0 %v4268_v62  ;;  %v4300_v7 = vld [vmem:[%s5686_s5 + $0x838] ss:$92 sps:$4 sm:$0xff]  }
 0x306   :  { %3711 = vmatprep.subr.bf16.mxu1 %v4269_v8  ;;  %v4305_v62 = vld [vmem:[%s5686_s5 + $0x8f4] ss:$92 sps:$4 sm:$0xff]  }
 0x307   :  { %v4303_v8 = vld [vmem:[%s5686_s5 + $0x8f0] ss:$92 sps:$4 sm:$0xff]  }
 0x308   :  { %3054 = vmatpush1.bf16.msra.mxu0 %v4266_v9  ;;  %v4308_v9 = vld [vmem:[%s5686_s5 + $0x9ac] ss:$92 sps:$4 sm:$0xff]  }
 0x309   :  { %3712 = vmatpush3.bf16.msra.mxu1 %v4270_v10  ;;  %3055 = vmatprep.subr.bf16.mxu0 %v4273_v11  ;;  %v4306_v10 = vld [vmem:[%s5686_s5 + $0x9a8] ss:$92 sps:$4 sm:$0xff]  }
 0x30a   :  { %3713 = vmatprep.subr.bf16.mxu1 %v4274_v12  ;;  %v4311_v11 = vld [vmem:[%s5686_s5 + $0xa64] ss:$92 sps:$4 sm:$0xff]  }
 0x30b   :  { %v4309_v12 = vld [vmem:[%s5686_s5 + $0xa60] ss:$92 sps:$4 sm:$0xff]  }
 0x30c   :  { %3056 = vmatpush1.bf16.msra.mxu0 %v4271_v17  ;;  %v4314_v17 = vld [vmem:[%s5686_s5 + $0xb1c] ss:$92 sps:$4 sm:$0xff]  }
 0x30d   :  { %3714 = vmatpush3.bf16.msra.mxu1 %v4275_v21  ;;  %3057 = vmatprep.subr.bf16.mxu0 %v4278_v22  ;;  %v4312_v21 = vld [vmem:[%s5686_s5 + $0xb18] ss:$92 sps:$4 sm:$0xff]   ;;  %v661_v22 = vld [vmem:[%s5689_s6 + $0x8] sm:$0xff] }
 0x30e   :  { %v2753_v31 = vpop.f32.mrb[8].mxu0  ;;  %v2794_v32 = vpop.f32.mrb[8].mxu1  ;;  %3715 = vmatprep.subr.bf16.mxu1 %v4279_v23  ;;  %v2557_v23 = vrot.slane %v661_v22, %v4639_v41 }
 0x30f   :  { %v2754_v33 = vadd.f32 %v2753_v31, %v2541_v24  ;;  %v2795_v35 = vadd.f32 %v2794_v32, %v2549_v25  ;;  %v2755_v37 = vpop.f32.mrb[9].mxu0  ;;  %v2796_v38 = vpop.f32.mrb[9].mxu1  ;;  %v2565_v24 = vrot.slane %v661_v22, %v5296_v34  ;;  %v2561_v25 = vrot.slane %v661_v22, %v4645_v43 }
 0x310   :  { %v2756_v44 = vadd.f32 %v2755_v37, %v2545_v26  ;;  %v2797_v45 = vadd.f32 %v2796_v38, %v2553_v27  ;;  %v2757_v46 = vpop.f32.mrb[10].mxu0  ;;  %v2798_v47 = vpop.f32.mrb[10].mxu1  ;;  %3058 = vmatpush1.bf16.msra.mxu0 %v4276_v28  ;;  %v2569_v26 = vrot.slane %v661_v22, %v5307_v42 }
 0x311   :  { %3716 = vmatpush3.bf16.msra.mxu1 %v4280_v29  ;;  %v2758_v49 = vpop.f32.mrb[11].mxu0  ;;  %v2799_v50 = vpop.f32.mrb[11].mxu1  ;;  %3059 = vmatprep.subr.bf16.mxu0 %v4283_v30 }
 0x312   :  { %v3153_v53 = vcombine.low %v2754_v33, %v2756_v44  ;;  %v3154_v54 = vcombine.low %v2795_v35, %v2797_v45  ;;  %3717 = vmatprep.subr.bf16.mxu1 %v4284_v36  ;;  %v2573_v49 = vrot.slane %v661_v22, %v5522_v15  ;;  %v2581_v50 = vrot.slane %v661_v22, %v5525_v16 }
 0x314   :  { %v3175_v56 = vrot.slane %v3153_v53, %v5339_v0  ;;  %v3182_v57 = vrot.slane %v3154_v54, %v5339_v0  ;;  %3060 = vmatpush1.bf16.msra.mxu0 %v4281_v48 }
 0x315   :  { %3718 = vmatpush3.bf16.msra.mxu1 %v4285_v51  ;;  %3061 = vmatprep.subr.bf16.mxu0 %v4288_v52  ;;  %v2577_v51 = vrot.slane %v661_v22, %v5531_v19  ;;  %v2585_v52 = vrot.slane %v661_v22, %v2552_v20 }
 0x316   :  { %v3184_v61 = vcombine.low %v3175_v56, %v3182_v57  ;;  %3719 = vmatprep.subr.bf16.mxu1 %v4289_v55 }
 0x318   :  { %v3198_v2 = vrot.slane %v3184_v61, %v5339_v0  ;;  %3062 = vmatpush1.bf16.msra.mxu0 %v4286_v58 }
 0x319   :  { %3720 = vmatpush3.bf16.msra.mxu1 %v4290_v59  ;;  %3063 = vmatprep.subr.bf16.mxu0 %v4293_v60 }
 0x31a   :  { %v3199_v5 = vcombine.low %v3191_v63, %v3198_v2 }
 0x31c   :  { %3300 = vst [vmem:[%s5690_s7] sm:$0xff] %v3199_v5  ;;  %3121 = vmatmul.mubr.bf16.vlgmr.msra.gmra.mrb[24].mxu1 %v4657_v1  ;;  %3064 = vmatpush1.bf16.msra.mxu0 %v4291_v3 }
 0x31d   :  { %3065 = vmatprep.subr.bf16.mxu0 %v4296_v4 }
 0x320   :  { %3066 = vmatpush1.bf16.msra.mxu0 %v4294_v13 }
 0x321   :  { %3067 = vmatprep.subr.bf16.mxu0 %v4299_v14 }
 0x324   :  { %3068 = vmatpush1.bf16.msra.mxu0 %v4297_v18 }
 0x325   :  { %3069 = vmatprep.subr.bf16.mxu0 %v4302_v6 }
 0x328   :  { %3070 = vmatpush1.bf16.msra.mxu0 %v4300_v7  ;;  %v662_v7 = vld [vmem:[%s5689_s6 + $0x10] sm:$0x7f] }
 0x329   :  { %3071 = vmatprep.subr.bf16.mxu0 %v4305_v62  ;;  %v2589_v62 = vrot.slane %v662_v7, %v4639_v41 }
 0x32c   :  { %3072 = vmatpush1.bf16.msra.mxu0 %v4303_v8  ;;  %v2597_v8 = vrot.slane %v662_v7, %v5296_v34 }
 0x32d   :  { %3073 = vmatprep.subr.bf16.mxu0 %v4308_v9  ;;  %v2593_v9 = vrot.slane %v662_v7, %v4645_v43 }
 0x330   :  { %3074 = vmatpush1.bf16.msra.mxu0 %v4306_v10  ;;  %v2601_v10 = vrot.slane %v662_v7, %v5307_v42 }
 0x331   :  { %3075 = vmatprep.subr.bf16.mxu0 %v4311_v11 }
 0x334   :  { %3076 = vmatpush1.bf16.msra.mxu0 %v4309_v12 }
 0x335   :  { %3077 = vmatprep.subr.bf16.mxu0 %v4314_v17 }
 0x338   :  { %3078 = vmatpush1.bf16.msra.mxu0 %v4312_v21 }
 0x33b   :  { %3080 = vmatmul.mubr.bf16.vlgmr.msra.gmra.mrb[24].mxu0 %v4657_v1 }
 0x34e   :  { %v2835_v27 = vpop.f32.mrb[12].mxu0 }
 0x34f   :  { %v2836_v28 = vadd.f32 %v2835_v27, %v2557_v23  ;;  %v2876_v29 = vpop.f32.mrb[12].mxu1  ;;  %v2837_v30 = vpop.f32.mrb[13].mxu0 }
 0x350   :  { %v2877_v31 = vadd.f32 %v2876_v29, %v2565_v24  ;;  %v2838_v32 = vadd.f32 %v2837_v30, %v2561_v25  ;;  %v2878_v36 = vpop.f32.mrb[13].mxu1  ;;  %v2839_v1 = vpop.f32.mrb[14].mxu0 }
 0x351   :  { %v2879_v33 = vadd.f32 %v2878_v36, %v2569_v26  ;;  %v2880_v35 = vpop.f32.mrb[14].mxu1  ;;  %v2840_v37 = vpop.f32.mrb[15].mxu0 }
 0x352   :  { %v3200_v38 = vcombine.low %v2836_v28, %v2838_v32  ;;  %v2881_v44 = vpop.f32.mrb[15].mxu1  ;;  %v2605_v35 = vrot.slane %v662_v7, %v5522_v15  ;;  %v2613_v37 = vrot.slane %v662_v7, %v5525_v16 }
 0x353   :  { %v3201_v45 = vcombine.low %v2877_v31, %v2879_v33 }
 0x354   :  { %v3210_v46 = vrot.slane %v3200_v38, %v5339_v0  ;;  %v2609_v38 = vrot.slane %v662_v7, %v5531_v19 }
 0x355   :  { %v3217_v47 = vrot.slane %v3201_v45, %v5339_v0 }
 0x357   :  { %v3232_v48 = vcombine.low %v3210_v46, %v3217_v47 }
 0x359   :  { %v3240_v20 = vrot.slane %v3232_v48, %v5339_v0 }
 0x38e   :  { %v2917_v53 = vpop.f32.mrb[16].mxu0 }
 0x38f   :  { %v2918_v54 = vadd.f32 %v2917_v53, %v2573_v49  ;;  %v2958_v55 = vpop.f32.mrb[16].mxu1  ;;  %v2919_v56 = vpop.f32.mrb[17].mxu0 }
 0x390   :  { %v2959_v57 = vadd.f32 %v2958_v55, %v2581_v50  ;;  %v2920_v58 = vadd.f32 %v2919_v56, %v2577_v51  ;;  %v2960_v59 = vpop.f32.mrb[17].mxu1  ;;  %v2921_v60 = vpop.f32.mrb[18].mxu0 }
 0x391   :  { %v2961_v61 = vadd.f32 %v2960_v59, %v2585_v52  ;;  %v2962_v63 = vpop.f32.mrb[18].mxu1  ;;  %v2922_v2 = vpop.f32.mrb[19].mxu0 }
 0x392   :  { %v3202_v3 = vcombine.low %v2918_v54, %v2920_v58  ;;  %v2963_v4 = vpop.f32.mrb[19].mxu1 }
 0x393   :  { %v3203_v5 = vcombine.low %v2959_v57, %v2961_v61 }
 0x394   :  { %v3224_v13 = vrot.slane %v3202_v3, %v5339_v0 }
 0x395   :  { %v3231_v14 = vrot.slane %v3203_v5, %v5339_v0 }
 0x397   :  { %v3233_v40 = vcombine.low %v3224_v13, %v3231_v14 }
 0x399   :  { %v3247_v18 = vrot.slane %v3233_v40, %v5339_v0 }
 0x39b   :  { %v3248_v6 = vcombine.low %v3240_v20, %v3247_v18 }
 0x39d   :  { %3301 = vst [vmem:[%s5690_s7 + $0x8] sm:$0xff] %v3248_v6 }
 0x3ce   :  { %v2999_v11 = vpop.f32.mrb[20].mxu0 }
 0x3cf   :  { %v3000_v12 = vadd.f32 %v2999_v11, %v2589_v62  ;;  %v3040_v17 = vpop.f32.mrb[20].mxu1  ;;  %v3001_v21 = vpop.f32.mrb[21].mxu0 }
 0x3d0   :  { %v3041_v22 = vadd.f32 %v3040_v17, %v2597_v8  ;;  %v3002_v23 = vadd.f32 %v3001_v21, %v2593_v9  ;;  %v3042_v24 = vpop.f32.mrb[21].mxu1  ;;  %v3003_v25 = vpop.f32.mrb[22].mxu0 }
 0x3d1   :  { %v3043_v26 = vadd.f32 %v3042_v24, %v2601_v10  ;;  %v3044_v27 = vpop.f32.mrb[22].mxu1  ;;  %v3004_v28 = vpop.f32.mrb[23].mxu0 }
 0x3d2   :  { %v3249_v29 = vcombine.low %v3000_v12, %v3002_v23  ;;  %v3045_v30 = vpop.f32.mrb[23].mxu1 }
 0x3d3   :  { %v3250_v41 = vcombine.low %v3041_v22, %v3043_v26 }
 0x3d4   :  { %v3258_v34 = vrot.slane %v3249_v29, %v5339_v0 }
 0x3d5   :  { %v3265_v43 = vrot.slane %v3250_v41, %v5339_v0 }
 0x3d7   :  { %v3280_v31 = vcombine.low %v3258_v34, %v3265_v43 }
 0x3d9   :  { %v3288_v55 = vrot.slane %v3280_v31, %v5339_v0 }
 0x3ef   :  { %v3721_v42 = vpop.f32.mrb[24].mxu1 }
 0x3f0   :  { %v3722_v32 = vpop.f32.mrb[25].mxu1 }
 0x3f1   :  { %v3723_v36 = vadd.f32 %v3722_v32, %v3721_v42  ;;  %v3724_v1 = vpop.f32.mrb[26].mxu1 }
 0x3f2   :  { %v3725_v33 = vpop.f32.mrb[27].mxu1 }
 0x3f3   :  { %v3123_v47 = vadd.f32 %v3723_v36, %v2613_v37 }
 0x3f5   :  { %v3279_v52 = vrot.slane %v3123_v47, %v5339_v0 }
 0x40e   :  { %v3081_v44 = vpop.f32.mrb[24].mxu0 }
 0x40f   :  { %v3082_v45 = vadd.f32 %v3081_v44, %v2605_v35  ;;  %v3083_v46 = vpop.f32.mrb[25].mxu0 }
 0x410   :  { %v3084_v48 = vadd.f32 %v3083_v46, %v2609_v38  ;;  %v3085_v49 = vpop.f32.mrb[26].mxu0 }
 0x411   :  { %v3086_v50 = vpop.f32.mrb[27].mxu0 }
 0x412   :  { %v3251_v51 = vcombine.low %v3082_v45, %v3084_v48 }
 0x414   :  { %v3272_v53 = vrot.slane %v3251_v51, %v5339_v0 }
 0x416   :  { %v3281_v54 = vcombine.low %v3272_v53, %v3279_v52 }
 0x418   :  { %v3295_v15 = vrot.slane %v3281_v54, %v5339_v0 }
 0x41a   :  { %v3296_v16 = vcombine.low %v3288_v55, %v3295_v15 }
 0x41c   :  { %3306 = vst.msk [vmem:[%s5690_s7 + $0x10] sm:$0x7f] %vm3304_vm3, %v3296_v16 }

</bundles_post_ra>
